<compile_context>
chip_gen: v7x
topology: tpu7x:2x2x1
jax: 0.10.0
libtpu: 0.0.40
codegen_flags: <defaults>
</compile_context>

<pallas_src>
import jax
import jax.numpy as jnp
from jax.experimental import pallas as pl
from jax.experimental.pallas import tpu as pltpu

KSIZE = 5
PAD = 2
LANE = 128

# Integer numerators of the 5x5 Gaussian kernel (denominator 273).
_GAUSS_INT = (
    (1, 4, 7, 4, 1),
    (4, 16, 26, 16, 4),
    (7, 26, 41, 26, 7),
    (4, 16, 26, 16, 4),
    (1, 4, 7, 4, 1),
)

# Group the 25 taps by their 6 unique coefficients -> 6 VPU multiplies instead
# of 25.  Sorted so the largest group comes first (it initializes the
# accumulator, saving one add and a zeros materialization).
_groups = {}
for _kh in range(KSIZE):
    for _kw in range(KSIZE):
        _groups.setdefault(_GAUSS_INT[_kh][_kw], []).append((_kh, _kw))
_TAP_GROUPS = tuple(sorted(_groups.items(), key=lambda kv: (-len(kv[1]), kv[0])))


def _cdiv(a, b):
    return -(-a // b)


def _gauss_blur_kernel(xp_ref, o_ref):
    # xp_ref: (H + 2*PAD, W + 2*PAD, BP) zero-padded input slab, planes on lanes.
    # o_ref : (H, W, BP) output slab.  BP is a multiple of 128 -> unmasked vst,
    # full-lane VPU, and every tap slice below is lane-aligned.
    H, W, _ = o_ref.shape
    acc = None
    for coef, taps in _TAP_GROUPS:
        kh0, kw0 = taps[0]
        g = xp_ref[pl.ds(kh0, H), pl.ds(kw0, W), :]
        for kh, kw in taps[1:]:
            g = g + xp_ref[pl.ds(kh, H), pl.ds(kw, W), :]
        term = g * (coef / 273.0)          # compile-time f32 immediate
        acc = term if acc is None else acc + term
    # Conv bias is identically zero in Gauss_Net -> no bias add.
    o_ref[...] = acc.astype(o_ref.dtype)


def _choose_plane_block(num_planes, H, W):
    """Pick BP (lane-block of planes, multiple of 128) and padded plane count."""
    per_lane = ((H + 2 * PAD) * (W + 2 * PAD) + H * W) * 4   # in+out bytes / lane
    budget = 20 << 20                                        # per buffered copy
    max_bp = max(LANE, (budget // per_lane) // LANE * LANE)
    p_lanes = _cdiv(num_planes, LANE) * LANE
    bp = min(max_bp, p_lanes)
    # v7x megacore: prefer >= 2 grid steps when there is enough data to split.
    if bp >= p_lanes and p_lanes >= 2 * LANE:
        bp = max(LANE, (p_lanes // 2) // LANE * LANE)
    p_pad = _cdiv(num_planes, bp) * bp
    return bp, p_pad


def _vmem_limit_bytes(H, W, bp):
    in_blk = (H + 2 * PAD) * (W + 2 * PAD) * bp * 4
    out_blk = H * W * bp * 4
    need = 2 * (in_blk + out_blk)            # double-buffered in + out
    # Exact need + margin for Mosaic internal scratch, capped under v7x's 64 MiB.
    return int(min(48 << 20, max(need + (2 << 20), 16 << 20)))


def gauss_net_forward(x_nchw, in_channels: int, out_channels: int):
    """Forward pass of Gauss_Net. Input and output are NCHW float32."""
    N, C, H, W = x_nchw.shape
    assert C == in_channels

    # weight[o, i] = gauss if o == i else 0  =>  out[o] = blur(x[o]) for
    # o < min(in, out); remaining output channels (if any) are exactly zero.
    c_common = min(in_channels, out_channels)
    P = N * c_common

    bp, p_pad = _choose_plane_block(P, H, W)
    # TODO(synk): for very large planes (one 128-lane block exceeding the VMEM
    # budget) the spatial dims would also need halo tiling; not needed here.

    x = x_nchw[:, :c_common].astype(jnp.float32).reshape(P, H, W)
    # Planes-on-lanes layout (lane-dense even for W < 128) + spatial halo
    # padding done once in HBM, so the kernel needs no scratch or zeroing.
    x_hwp = jnp.pad(jnp.transpose(x, (1, 2, 0)),
                    ((PAD, PAD), (PAD, PAD), (0, p_pad - P)))

    blurred = pl.pallas_call(
        _gauss_blur_kernel,
        out_shape=jax.ShapeDtypeStruct((H, W, p_pad), jnp.float32),
        grid=(p_pad // bp,),
        in_specs=[pl.BlockSpec((H + 2 * PAD, W + 2 * PAD, bp),
                               lambda i: (0, 0, i))],
        out_specs=pl.BlockSpec((H, W, bp), lambda i: (0, 0, i)),
        compiler_params=pltpu.CompilerParams(
            dimension_semantics=("parallel",),
            vmem_limit_bytes=_vmem_limit_bytes(H, W, bp),
        ),
    )(x_hwp)

    out = jnp.transpose(blurred[:, :, :P], (2, 0, 1)).reshape(N, c_common, H, W)
    if out_channels > c_common:
        # jnp.pad (fusable) instead of concatenate -> no extra HBM pass.
        out = jnp.pad(out, ((0, 0), (0, out_channels - c_common), (0, 0), (0, 0)))
    return out


def _reference_conv(x_nchw, in_channels, out_channels):
    """Pure-JAX reference (lax conv) matching Gauss_Net exactly."""
    gauss = jnp.array(_GAUSS_INT, dtype=jnp.float32) / 273.0
    eye = jnp.eye(out_channels, in_channels, dtype=jnp.float32)
    w = eye[:, :, None, None] * gauss[None, None, :, :]   # (O, I, 5, 5)
    return jax.lax.conv_general_dilated(
        x_nchw.astype(jnp.float32),
        w,
        window_strides=(1, 1),
        padding=((PAD, PAD), (PAD, PAD)),
        dimension_numbers=("NCHW", "OIHW", "NCHW"),
    )


if __name__ == "__main__":
    key = jax.random.PRNGKey(0)
    N, C, H, W = 2, 4, 16, 16           # small NCHW input, in_channels == out_channels == 4
    x = jax.random.normal(key, (N, C, H, W), dtype=jnp.float32)

    out = jax.block_until_ready(gauss_net_forward(x, in_channels=C, out_channels=C))
    ref = jax.block_until_ready(_reference_conv(x, C, C))

    assert out.shape == (N, C, H, W)
    assert jnp.allclose(out, ref, atol=1e-5, rtol=1e-5), float(jnp.max(jnp.abs(out - ref)))

    print("KERNEL_OK")
</pallas_src>

<mosaic_0001>
module attributes {stable_mosaic.version = 11 : i64} {
  func.func @_gauss_blur_kernel(%arg0: i32, %arg1: memref<20x20x128xf32, #tpu.memory_space<vmem>>, %arg2: memref<16x16x128xf32, #tpu.memory_space<vmem>>) attributes {dimension_semantics = [#tpu.dimension_semantics<parallel>], iteration_bounds = array<i64: 1>, scalar_prefetch = 0 : i64, scratch_operands = 0 : i64, tpu.core_type = #tpu.core_type<tc>, window_params = [{transform_indices = @transform_0, window_bounds = array<i64: 20, 20, 128>}, {transform_indices = @transform_1, window_bounds = array<i64: 16, 16, 128>}]} {
    %c0 = arith.constant 0 : index
    %c1 = arith.constant 1 : index
    %c0_0 = arith.constant 0 : index
    %0 = vector.load %arg1[%c0, %c1, %c0_0] : memref<20x20x128xf32, #tpu.memory_space<vmem>>, vector<16x16x128xf32>
    %c0_1 = arith.constant 0 : index
    %c3 = arith.constant 3 : index
    %c0_2 = arith.constant 0 : index
    %1 = vector.load %arg1[%c0_1, %c3, %c0_2] : memref<20x20x128xf32, #tpu.memory_space<vmem>>, vector<16x16x128xf32>
    %2 = arith.addf %0, %1 : vector<16x16x128xf32>
    %c1_3 = arith.constant 1 : index
    %c0_4 = arith.constant 0 : index
    %c0_5 = arith.constant 0 : index
    %3 = vector.load %arg1[%c1_3, %c0_4, %c0_5] : memref<20x20x128xf32, #tpu.memory_space<vmem>>, vector<16x16x128xf32>
    %4 = arith.addf %2, %3 : vector<16x16x128xf32>
    %c1_6 = arith.constant 1 : index
    %c4 = arith.constant 4 : index
    %c0_7 = arith.constant 0 : index
    %5 = vector.load %arg1[%c1_6, %c4, %c0_7] : memref<20x20x128xf32, #tpu.memory_space<vmem>>, vector<16x16x128xf32>
    %6 = arith.addf %4, %5 : vector<16x16x128xf32>
    %c3_8 = arith.constant 3 : index
    %c0_9 = arith.constant 0 : index
    %c0_10 = arith.constant 0 : index
    %7 = vector.load %arg1[%c3_8, %c0_9, %c0_10] : memref<20x20x128xf32, #tpu.memory_space<vmem>>, vector<16x16x128xf32>
    %8 = arith.addf %6, %7 : vector<16x16x128xf32>
    %c3_11 = arith.constant 3 : index
    %c4_12 = arith.constant 4 : index
    %c0_13 = arith.constant 0 : index
    %9 = vector.load %arg1[%c3_11, %c4_12, %c0_13] : memref<20x20x128xf32, #tpu.memory_space<vmem>>, vector<16x16x128xf32>
    %10 = arith.addf %8, %9 : vector<16x16x128xf32>
    %c4_14 = arith.constant 4 : index
    %c1_15 = arith.constant 1 : index
    %c0_16 = arith.constant 0 : index
    %11 = vector.load %arg1[%c4_14, %c1_15, %c0_16] : memref<20x20x128xf32, #tpu.memory_space<vmem>>, vector<16x16x128xf32>
    %12 = arith.addf %10, %11 : vector<16x16x128xf32>
    %c4_17 = arith.constant 4 : index
    %c3_18 = arith.constant 3 : index
    %c0_19 = arith.constant 0 : index
    %13 = vector.load %arg1[%c4_17, %c3_18, %c0_19] : memref<20x20x128xf32, #tpu.memory_space<vmem>>, vector<16x16x128xf32>
    %14 = arith.addf %12, %13 : vector<16x16x128xf32>
    %cst = arith.constant 0.0146520147 : f32
    %15 = vector.broadcast %cst : f32 to vector<16x16x128xf32>
    %16 = arith.mulf %14, %15 : vector<16x16x128xf32>
    %c0_20 = arith.constant 0 : index
    %c0_21 = arith.constant 0 : index
    %c0_22 = arith.constant 0 : index
    %17 = vector.load %arg1[%c0_20, %c0_21, %c0_22] : memref<20x20x128xf32, #tpu.memory_space<vmem>>, vector<16x16x128xf32>
    %c0_23 = arith.constant 0 : index
    %c4_24 = arith.constant 4 : index
    %c0_25 = arith.constant 0 : index
    %18 = vector.load %arg1[%c0_23, %c4_24, %c0_25] : memref<20x20x128xf32, #tpu.memory_space<vmem>>, vector<16x16x128xf32>
    %19 = arith.addf %17, %18 : vector<16x16x128xf32>
    %c4_26 = arith.constant 4 : index
    %c0_27 = arith.constant 0 : index
    %c0_28 = arith.constant 0 : index
    %20 = vector.load %arg1[%c4_26, %c0_27, %c0_28] : memref<20x20x128xf32, #tpu.memory_space<vmem>>, vector<16x16x128xf32>
    %21 = arith.addf %19, %20 : vector<16x16x128xf32>
    %c4_29 = arith.constant 4 : index
    %c4_30 = arith.constant 4 : index
    %c0_31 = arith.constant 0 : index
    %22 = vector.load %arg1[%c4_29, %c4_30, %c0_31] : memref<20x20x128xf32, #tpu.memory_space<vmem>>, vector<16x16x128xf32>
    %23 = arith.addf %21, %22 : vector<16x16x128xf32>
    %cst_32 = arith.constant 0.00366300368 : f32
    %24 = vector.broadcast %cst_32 : f32 to vector<16x16x128xf32>
    %25 = arith.mulf %23, %24 : vector<16x16x128xf32>
    %26 = arith.addf %16, %25 : vector<16x16x128xf32>
    %c0_33 = arith.constant 0 : index
    %c2 = arith.constant 2 : index
    %c0_34 = arith.constant 0 : index
    %27 = vector.load %arg1[%c0_33, %c2, %c0_34] : memref<20x20x128xf32, #tpu.memory_space<vmem>>, vector<16x16x128xf32>
    %c2_35 = arith.constant 2 : index
    %c0_36 = arith.constant 0 : index
    %c0_37 = arith.constant 0 : index
    %28 = vector.load %arg1[%c2_35, %c0_36, %c0_37] : memref<20x20x128xf32, #tpu.memory_space<vmem>>, vector<16x16x128xf32>
    %29 = arith.addf %27, %28 : vector<16x16x128xf32>
    %c2_38 = arith.constant 2 : index
    %c4_39 = arith.constant 4 : index
    %c0_40 = arith.constant 0 : index
    %30 = vector.load %arg1[%c2_38, %c4_39, %c0_40] : memref<20x20x128xf32, #tpu.memory_space<vmem>>, vector<16x16x128xf32>
    %31 = arith.addf %29, %30 : vector<16x16x128xf32>
    %c4_41 = arith.constant 4 : index
    %c2_42 = arith.constant 2 : index
    %c0_43 = arith.constant 0 : index
    %32 = vector.load %arg1[%c4_41, %c2_42, %c0_43] : memref<20x20x128xf32, #tpu.memory_space<vmem>>, vector<16x16x128xf32>
    %33 = arith.addf %31, %32 : vector<16x16x128xf32>
    %cst_44 = arith.constant 0.025641026 : f32
    %34 = vector.broadcast %cst_44 : f32 to vector<16x16x128xf32>
    %35 = arith.mulf %33, %34 : vector<16x16x128xf32>
    %36 = arith.addf %26, %35 : vector<16x16x128xf32>
    %c1_45 = arith.constant 1 : index
    %c1_46 = arith.constant 1 : index
    %c0_47 = arith.constant 0 : index
    %37 = vector.load %arg1[%c1_45, %c1_46, %c0_47] : memref<20x20x128xf32, #tpu.memory_space<vmem>>, vector<16x16x128xf32>
    %c1_48 = arith.constant 1 : index
    %c3_49 = arith.constant 3 : index
    %c0_50 = arith.constant 0 : index
    %38 = vector.load %arg1[%c1_48, %c3_49, %c0_50] : memref<20x20x128xf32, #tpu.memory_space<vmem>>, vector<16x16x128xf32>
    %39 = arith.addf %37, %38 : vector<16x16x128xf32>
    %c3_51 = arith.constant 3 : index
    %c1_52 = arith.constant 1 : index
    %c0_53 = arith.constant 0 : index
    %40 = vector.load %arg1[%c3_51, %c1_52, %c0_53] : memref<20x20x128xf32, #tpu.memory_space<vmem>>, vector<16x16x128xf32>
    %41 = arith.addf %39, %40 : vector<16x16x128xf32>
    %c3_54 = arith.constant 3 : index
    %c3_55 = arith.constant 3 : index
    %c0_56 = arith.constant 0 : index
    %42 = vector.load %arg1[%c3_54, %c3_55, %c0_56] : memref<20x20x128xf32, #tpu.memory_space<vmem>>, vector<16x16x128xf32>
    %43 = arith.addf %41, %42 : vector<16x16x128xf32>
    %cst_57 = arith.constant 0.0586080588 : f32
    %44 = vector.broadcast %cst_57 : f32 to vector<16x16x128xf32>
    %45 = arith.mulf %43, %44 : vector<16x16x128xf32>
    %46 = arith.addf %36, %45 : vector<16x16x128xf32>
    %c1_58 = arith.constant 1 : index
    %c2_59 = arith.constant 2 : index
    %c0_60 = arith.constant 0 : index
    %47 = vector.load %arg1[%c1_58, %c2_59, %c0_60] : memref<20x20x128xf32, #tpu.memory_space<vmem>>, vector<16x16x128xf32>
    %c2_61 = arith.constant 2 : index
    %c1_62 = arith.constant 1 : index
    %c0_63 = arith.constant 0 : index
    %48 = vector.load %arg1[%c2_61, %c1_62, %c0_63] : memref<20x20x128xf32, #tpu.memory_space<vmem>>, vector<16x16x128xf32>
    %49 = arith.addf %47, %48 : vector<16x16x128xf32>
    %c2_64 = arith.constant 2 : index
    %c3_65 = arith.constant 3 : index
    %c0_66 = arith.constant 0 : index
    %50 = vector.load %arg1[%c2_64, %c3_65, %c0_66] : memref<20x20x128xf32, #tpu.memory_space<vmem>>, vector<16x16x128xf32>
    %51 = arith.addf %49, %50 : vector<16x16x128xf32>
    %c3_67 = arith.constant 3 : index
    %c2_68 = arith.constant 2 : index
    %c0_69 = arith.constant 0 : index
    %52 = vector.load %arg1[%c3_67, %c2_68, %c0_69] : memref<20x20x128xf32, #tpu.memory_space<vmem>>, vector<16x16x128xf32>
    %53 = arith.addf %51, %52 : vector<16x16x128xf32>
    %cst_70 = arith.constant 0.095238097 : f32
    %54 = vector.broadcast %cst_70 : f32 to vector<16x16x128xf32>
    %55 = arith.mulf %53, %54 : vector<16x16x128xf32>
    %56 = arith.addf %46, %55 : vector<16x16x128xf32>
    %c2_71 = arith.constant 2 : index
    %c2_72 = arith.constant 2 : index
    %c0_73 = arith.constant 0 : index
    %57 = vector.load %arg1[%c2_71, %c2_72, %c0_73] : memref<20x20x128xf32, #tpu.memory_space<vmem>>, vector<16x16x128xf32>
    %cst_74 = arith.constant 0.150183156 : f32
    %58 = vector.broadcast %cst_74 : f32 to vector<16x16x128xf32>
    %59 = arith.mulf %57, %58 : vector<16x16x128xf32>
    %60 = arith.addf %56, %59 : vector<16x16x128xf32>
    %c0_75 = arith.constant 0 : index
    %c0_76 = arith.constant 0 : index
    %c0_77 = arith.constant 0 : index
    %61 = vector.load %arg2[%c0_75, %c0_76, %c0_77] : memref<16x16x128xf32, #tpu.memory_space<vmem>>, vector<16x16x128xf32>
    tpu.vector_store %arg2[%c0_75, %c0_76, %c0_77], %60 {strides = array<i32>} : memref<16x16x128xf32, #tpu.memory_space<vmem>>, vector<16x16x128xf32>,
    return
  }
  func.func @transform_0(%arg0: i32) -> (i32, i32, i32) {
    %c0_i32 = arith.constant 0 : i32
    %c0_i32_0 = arith.constant 0 : i32
    %c0_i32_1 = arith.constant 0 : i32
    return %c0_i32, %c0_i32_0, %arg0 : i32, i32, i32
  }
  func.func @transform_1(%arg0: i32) -> (i32, i32, i32) {
    %c0_i32 = arith.constant 0 : i32
    %c0_i32_0 = arith.constant 0 : i32
    %c0_i32_1 = arith.constant 0 : i32
    return %c0_i32, %c0_i32_0, %arg0 : i32, i32, i32
  }
}

</mosaic_0001>

<bundles_post_ra>
// kernel: tpu_custom_call.1
= control target key start
LH: loop header
LB: loop body
LE: loop exit
PB: predicated region body
PF: predicated region fallthrough
CT: control target
= control target key end

     0   :  { %6 = vsyncpa [#allocation3], 0  ;;  %s2994_s0 = inlined_call_operand.hbm [shape: f32[20,20,128], index: 0, kind: input, shape index: {}]   ;;  %s2995_s1 = inlined_call_operand.hbm [shape: f32[16,16,128], index: 1, kind: output, shape index: {}]  }
   0x1   :  { %7 = vsyncpa [#allocation4], 0  ;;  %s1888_s6 = smov [#allocation2]   ;;  %s1840_s10 = scalar_lea.hbm %s2994_s0, 7680 }
   0x2   :  { %s13_s7 = sshll.u32 %s1888_s6, 4  ;;  %p1841_p0 = scmp.ne.s32.totalorder %s2994_s0, %s1840_s10  ;;  %s14_s7 = int_to_ptr.vmem [resolvable:$true] %s13_s7 }
   0x3   :  { %p1844_p1 = scmp.lt.u32.totalorder %s1840_s10, %s2994_s0 }
   0x5   :  { %p1846_p2 = pnand %p1844_p1, %p1841_p0 }
   0x7   :  { %1849 = shalt.err (!%p1846_p2)
}
   0x8   :  { %s1850_s15 = scalar_lea.vmem %s14_s7, 7680  ;;  %p1855_p4 = scmp.lt.s32.totalorder %s14_s7, %s14_s7 }
   0x9   :  { %p1851_p3 = scmp.ne.s32.totalorder %s14_s7, %s1850_s15  ;;  %p1856_p5 = scmp.lt.s32.totalorder %s1850_s15, %s1850_s15 }
   0xb   :  { %p1857_p6 = por %p1856_p5, %p1855_p4 }
   0xd   :  { %p1858_p7 = pnand %p1857_p6, %p1851_p3 }
   0xf   :  { %1861 = shalt.err (!%p1858_p7)
}
  0x10   :  { %s1889_s16 = smov 128   ;;  %s1890_s17 = smov 8  }
  0x11   :  { %19 = dma.hbm_to_vmem [thread:$0]  %s2994_s0, 7680, %s14_s7, [#allocation3], %s1889_s16, %s1889_s16, %s1890_s17  }
  0x12   :  { %1884 = dma.done.wait [#allocation3], 7680  }
  0x13   :  { %1885 = vsyncadd [#allocation3], 4294959616  ;;  %v23_v0 = vld [vmem:[#allocation2 + $0x1] sm:$0xff]  ;;  %v120_v2 = vld [vmem:[#allocation2 + $0x18] sm:$0xff]  ;;  %s1891_s0 = smov [#allocation5]  }
  0x14   :  { %v55_v1 = vld [vmem:[#allocation2 + $0x3] sm:$0xff]  ;;  %v1923_v11 = vld [vmem:[#allocation2 + $0x4c] sm:$0xff]  ;;  %v1115_v18 = vld [vmem:[#allocation2 + $0x19] sm:$0xff]  ;;  %s1824_s20 = sshll.u32 %s1891_s0, 4  ;;  %s1825_s20 = int_to_ptr.vmem [resolvable:$true] %s1824_s20 }
  0x15   :  { %v87_v3 = vadd.f32 %v55_v1, %v23_v0  ;;  %v184_v4 = vld [vmem:[#allocation2 + $0x1c] sm:$0xff]  ;;  %v1917_v7 = vld [vmem:[#allocation2 + $0x48] sm:$0xff]  ;;  %v859_v14 = vld [vmem:[#allocation2 + $0x30] sm:$0xff]  ;;  %s1862_s21 = scalar_lea.vmem %s1825_s20, 4096  ;;  %p1867_p9 = scmp.lt.s32.totalorder %s1825_s20, %s1825_s20 }
  0x16   :  { %v538_v5 = vld [vmem:[#allocation2] sm:$0xff]  ;;  %v1927_v20 = vadd.f32 %v184_v4, %v120_v2  ;;  %v923_v23 = vld [vmem:[#allocation2 + $0x34] sm:$0xff]  ;;  %v1934_v26 = vadd.f32 %v1923_v11, %v1917_v7  ;;  %v1941_v30 = vld [vmem:[#allocation2 + $0x49] sm:$0xff]  ;;  %p1863_p8 = scmp.ne.s32.totalorder %s1825_s20, %s1862_s21  ;;  %p1868_p10 = scmp.lt.s32.totalorder %s1862_s21, %s1862_s21 }
  0x17   :  { %v152_v6 = vadd.f32 %v120_v2, %v87_v3  ;;  %v1919_v8 = vld [vmem:[#allocation2 + $0x61] sm:$0xff]  ;;  %v1435_v31 = vld [vmem:[#allocation2 + $0x31] sm:$0xff]  ;;  %v1943_v32 = vadd.f32 %v923_v23, %v859_v14  ;;  %v24_v38 = vld [vmem:[#allocation2 + $0x9] sm:$0xff] }
  0x18   :  { %v1921_v9 = vld [vmem:[#allocation2 + $0x63] sm:$0xff]  ;;  %v1147_v19 = vld [vmem:[#allocation2 + $0x1b] sm:$0xff]  ;;  %2999 = vst [vmem:[#allocation8_spill] sm:$0xff] %v1934_v26  ;;  %v56_v39 = vld [vmem:[#allocation2 + $0xb] sm:$0xff]  ;;  %p1869_p11 = por %p1868_p10, %p1867_p9 }
  0x19   :  { %v570_v10 = vld [vmem:[#allocation2 + $0x4] sm:$0xff]  ;;  %v216_v15 = vadd.f32 %v184_v4, %v152_v6  ;;  %v1179_v24 = vadd.f32 %v1147_v19, %v1115_v18  ;;  %v1403_v25 = vld [vmem:[#allocation2 + $0x1a] sm:$0xff]  ;;  %v1938_v27 = vadd.f32 %v1921_v9, %v1919_v8  ;;  %v1955_v44 = vld [vmem:[#allocation2 + $0x32] sm:$0xff]  ;;  %v88_v45 = vadd.f32 %v56_v39, %v24_v38 }
  0x1a   :  { %v602_v12 = vadd.f32 %v570_v10, %v538_v5  ;;  %v826_v13 = vld [vmem:[#allocation2 + $0x2] sm:$0xff]  ;;  %v1467_v37 = vadd.f32 %v1435_v31, %v1403_v25  ;;  %v1499_v43 = vld [vmem:[#allocation2 + $0x33] sm:$0xff]  ;;  %v893_v47 = vadd.f32 %v1403_v25, %v1917_v7  ;;  %v1960_v48 = vld [vmem:[#allocation2 + $0x4b] sm:$0xff]  ;;  %v1963_v50 = vmul.f32 0.15018316, %v1955_v44  ;;  %p1870_p12 = pnand %p1869_p11, %p1863_p8 }
  0x1b   :  { %v1925_v16 = vld [vmem:[#allocation2 + $0x60] sm:$0xff]  ;;  %v891_v17 = vadd.f32 %v859_v14, %v826_v13  ;;  %3000 = vst [vmem:[#allocation9_spill] sm:$0xff] %v1938_v27  ;;  %v281_v28 = vadd.f32 %v1917_v7, %v216_v15  ;;  %v1243_v36 = vadd.f32 %v1941_v30, %v1179_v24  ;;  %v154_v40 = vadd.f32 %v1179_v24, %v859_v14  ;;  %v1972_v57 = vld [vmem:[#allocation2 + $0x4a] sm:$0xff]  ;;  %v1976_v1 = vld [vmem:[#allocation2 + $0x38] sm:$0xff] }
  0x1c   :  { %v666_v21 = vadd.f32 %v1925_v16, %v602_v12  ;;  %v1930_v22 = vld [vmem:[#allocation2 + $0x64] sm:$0xff]  ;;  %v1531_v49 = vadd.f32 %v1499_v43, %v1467_v37  ;;  %v571_v60 = vld [vmem:[#allocation2 + $0xc] sm:$0xff]  ;;  %v957_v12 = vadd.f32 %v893_v47, %v1923_v11  ;;  %v1988_v15 = vld [vmem:[#allocation2 + $0x3c] sm:$0xff]  ;;  %v1991_v19 = vadd.f32 %v1499_v43, %v1435_v31 }
  0x1d   :  { %v955_v29 = vadd.f32 %v923_v23, %v891_v17  ;;  %v1947_v33 = vadd.f32 %v1930_v22, %v1925_v16  ;;  %v1950_v35 = vld [vmem:[#allocation2 + $0x62] sm:$0xff]  ;;  %v345_v41 = vadd.f32 %v1923_v11, %v281_v28  ;;  %v218_v52 = vadd.f32 %v923_v23, %v154_v40  ;;  %v827_v0 = vld [vmem:[#allocation2 + $0xa] sm:$0xff]  ;;  %v1999_v39 = vld [vmem:[#allocation2 + $0x54] sm:$0xff] }
  0x1e   :  { %v730_v34 = vadd.f32 %v1930_v22, %v666_v21  ;;  %v1957_v46 = vld [vmem:[#allocation2 + $0x20] sm:$0xff]  ;;  %v1968_v53 = vmul.f32 0.15018316, %v1950_v35  ;;  %v1307_v56 = vadd.f32 %v1960_v48, %v1243_v36  ;;  %v539_v59 = vld [vmem:[#allocation2 + $0x8] sm:$0xff]  ;;  %v1595_v62 = vadd.f32 %v1972_v57, %v1531_v49  ;;  %v1985_v13 = vld [vmem:[#allocation2 + $0x50] sm:$0xff] }
  0x1f   :  { %3001 = vst [vmem:[#allocation10_spill] sm:$0xff] %v1947_v33  ;;  %v1019_v42 = vadd.f32 %v1950_v35, %v955_v29  ;;  %v1965_v51 = vld [vmem:[#allocation2 + $0x24] sm:$0xff]  ;;  %v410_v54 = vadd.f32 %v1919_v8, %v345_v41  ;;  %v153_v58 = vadd.f32 %v1957_v46, %v88_v45  ;;  %v603_v63 = vadd.f32 %v571_v60, %v539_v59  ;;  %v1996_v25 = vld [vmem:[#allocation2 + $0x6c] sm:$0xff]  ;;  %v1436_v36 = vld [vmem:[#allocation2 + $0x39] sm:$0xff] }
  0x20   :  { %3002 = vst [vmem:[#allocation11_spill] sm:$0xff] %v1968_v53  ;;  %v762_v55 = vmul.f32 0.0036630037, %v730_v34  ;;  %v283_v2 = vadd.f32 %v1925_v16, %v218_v52  ;;  %v1981_v5 = vld [vmem:[#allocation2 + $0x68] sm:$0xff]  ;;  %v892_v6 = vadd.f32 %v1976_v1, %v827_v0  ;;  %v1469_v21 = vadd.f32 %v1955_v44, %v1941_v30  ;;  %v2002_v40 = vld [vmem:[#allocation2 + $0x51] sm:$0xff]  ;;  %v1500_v49 = vld [vmem:[#allocation2 + $0x3b] sm:$0xff] }
  0x21   :  { %v1051_v61 = vmul.f32 0.025641026, %v1019_v42  ;;  %v474_v3 = vadd.f32 %v1921_v9, %v410_v54  ;;  %v217_v4 = vadd.f32 %v1965_v51, %v153_v58  ;;  %v1116_v10 = vld [vmem:[#allocation2 + $0x21] sm:$0xff]  ;;  %v667_v14 = vadd.f32 %v1981_v5, %v603_v63  ;;  %v2005_v45 = vld [vmem:[#allocation2 + $0x6a] sm:$0xff]  ;;  %v2008_v52 = vld [vmem:[#allocation2 + $0x79] sm:$0xff] }
  0x22   :  { %v1148_v17 = vld [vmem:[#allocation2 + $0x23] sm:$0xff]  ;;  %v347_v18 = vadd.f32 %v1930_v22, %v283_v2  ;;  %v956_v28 = vadd.f32 %v1988_v15, %v892_v6  ;;  %v1339_v37 = vmul.f32 0.05860806, %v1307_v56  ;;  %v1627_v38 = vmul.f32 0.0952381, %v1595_v62  ;;  %v2015_v59 = vld [vmem:[#allocation2 + $0x53] sm:$0xff] }
  0x23   :  { %v506_v23 = vmul.f32 0.014652015, %v474_v3  ;;  %v282_v24 = vadd.f32 %v1985_v13, %v217_v4  ;;  %v1180_v29 = vadd.f32 %v1148_v17, %v1116_v10  ;;  %v1404_v34 = vld [vmem:[#allocation2 + $0x22] sm:$0xff]  ;;  %v731_v31 = vadd.f32 %v1996_v25, %v667_v14  ;;  %v2025_v10 = vld [vmem:[#allocation2 + $0x78] sm:$0xff]  ;;  %v2029_v17 = vld [vmem:[#allocation2 + $0x6b] sm:$0xff] }
  0x24   :  { %v1468_v41 = vadd.f32 %v1436_v36, %v1404_v34  ;;  %v1245_v54 = vadd.f32 %v1991_v19, %v1919_v8  ;;  %v2012_v56 = vld [vmem:[#allocation2 + $0x69] sm:$0xff]  ;;  %v1020_v58 = vadd.f32 %v2005_v45, %v956_v28  ;;  %v412_v62 = vadd.f32 %v2008_v52, %v347_v18  ;;  %v2023_v6 = vld [vmem:[#allocation2 + $0x7b] sm:$0xff] }
  0x25   :  { %v794_v42 = vadd.f32 %v762_v55, %v506_v23  ;;  %v346_v43 = vadd.f32 %v1999_v39, %v282_v24  ;;  %v1244_v47 = vadd.f32 %v2002_v40, %v1180_v29  ;;  %v2017_v55 = vld [vmem:[#allocation2 + $0x52] sm:$0xff]  ;;  %v1533_v63 = vadd.f32 %v1469_v21, %v1960_v48  ;;  %v2027_v14 = vld [vmem:[#allocation2 + $0x7a] sm:$0xff] }
  0x26   :  { %v1532_v60 = vadd.f32 %v1500_v49, %v1468_v41  ;;  %3003 = vst [vmem:[#allocation12_spill] sm:$0xff] %v2017_v55  ;;  %v763_v3 = vmul.f32 0.0036630037, %v731_v31  ;;  %v2032_v24 = vld [vmem:[#allocation2 + $0x3a] sm:$0xff]  ;;  %v476_v18 = vadd.f32 %v2023_v6, %v412_v62  ;;  %v1021_v21 = vadd.f32 %v2027_v14, %v957_v12 }
  0x27   :  { %v1083_v0 = vadd.f32 %v1051_v61, %v794_v42  ;;  %v411_v2 = vadd.f32 %v2012_v56, %v346_v43  ;;  %v1308_v4 = vadd.f32 %v2015_v59, %v1244_v47  ;;  %v668_v61 = vadd.f32 %v2025_v10, %v1927_v20  ;;  %v2040_v42 = vld [vmem:[#allocation2 + $0x7c] sm:$0xff] }
  0x28   :  { %v1596_v23 = vadd.f32 %v2017_v55, %v1532_v60  ;;  %v1724_v41 = vmul.f32 0.15018316, %v2032_v24  ;;  %v1309_v43 = vadd.f32 %v1245_v54, %v1921_v9  ;;  %v1052_v47 = vmul.f32 0.025641026, %v1020_v58 }
  0x29   :  { %v1371_v28 = vadd.f32 %v1339_v37, %v1083_v0  ;;  %v475_v31 = vadd.f32 %v2029_v17, %v411_v2  ;;  %v1340_v60 = vmul.f32 0.05860806, %v1308_v4  ;;  %v508_v33 = vmul.f32 0.014652015, %v476_v18  ;;  %v2049_v4 = vld [vmem:[#allocation2 + $0x80] sm:$0xff] }
  0x2a   :  { %v732_v53 = vadd.f32 %v2040_v42, %v668_v61  ;;  %v1628_v26 = vmul.f32 0.0952381, %v1596_v23  ;;  %v1597_v20 = vadd.f32 %v1533_v63, %v1950_v35  ;;  %v1053_v37 = vmul.f32 0.025641026, %v1021_v21  ;;  %v2054_v21 = vld [vmem:[#allocation2 + $0x84] sm:$0xff] }
  0x2b   :  { %v1659_v62 = vadd.f32 %v1627_v38, %v1371_v28  ;;  %v507_v27 = vmul.f32 0.014652015, %v475_v31  ;;  %v155_v0 = vadd.f32 %v1180_v29, %v1976_v1  ;;  %v605_v2 = vadd.f32 %v1965_v51, %v1957_v46 }
  0x2c   :  { %v764_v12 = vmul.f32 0.0036630037, %v732_v53  ;;  %v1341_v58 = vmul.f32 0.05860806, %v1309_v43  ;;  %v894_v18 = vadd.f32 %v1404_v34, %v1985_v13  ;;  %v1182_v53 = vadd.f32 %v1500_v49, %v1436_v36  ;;  %v2061_v34 = vld [vmem:[#allocation2 + $0x82] sm:$0xff] }
  0x2d   :  { %v1755_v55 = vadd.f32 %v1963_v50, %v1659_v62  ;;  %v795_v54 = vadd.f32 %v763_v3, %v507_v27  ;;  %v219_v23 = vadd.f32 %v1988_v15, %v155_v0  ;;  %v669_v63 = vadd.f32 %v2049_v4, %v605_v2  ;;  %v2078_v2 = vld [vmem:[#allocation2 + $0x90] sm:$0xff] }
  0x2e   :  { %v796_v38 = vadd.f32 %v764_v12, %v508_v33  ;;  %v1629_v29 = vmul.f32 0.0952381, %v1597_v20  ;;  %v958_v46 = vadd.f32 %v894_v18, %v1999_v39  ;;  %v1470_v27 = vadd.f32 %v2032_v24, %v2002_v40  ;;  %v2074_v12 = vld [vmem:[#allocation2 + $0x81] sm:$0xff] }
  0x2f   :  { %1787 = vst [vmem:[#allocation5] sm:$0xff] %v1755_v55  ;;  %v1084_v61 = vadd.f32 %v1052_v47, %v795_v54  ;;  %v284_v51 = vadd.f32 %v1981_v5, %v219_v23  ;;  %v733_v33 = vadd.f32 %v2054_v21, %v669_v63  ;;  %v1246_v3 = vadd.f32 %v1182_v53, %v2012_v56 }
  0x30   :  { %v1085_v50 = vadd.f32 %v1053_v37, %v796_v38  ;;  %v1022_v49 = vadd.f32 %v2061_v34, %v958_v46  ;;  %v1534_v55 = vadd.f32 %v1470_v27, %v2015_v59  ;;  %v156_v28 = vadd.f32 %v1991_v19, %v1917_v7  ;;  %v2087_v38 = vld [vmem:[#allocation2 + $0x94] sm:$0xff] }
  0x31   :  { %v1372_v36 = vadd.f32 %v1340_v60, %v1084_v61  ;;  %v1725_v43 = vmul.f32 0.15018316, %v1972_v57  ;;  %v348_v47 = vadd.f32 %v1996_v25, %v284_v51  ;;  %v2072_v62 = vadd.f32 %v1960_v48, %v1941_v30  ;;  %v2084_v48 = vld [vmem:[#allocation2 + $0x83] sm:$0xff]  ;;  %v2099_v27 = vld [vmem:[#allocation2 + $0x92] sm:$0xff] }
  0x32   :  { %v1373_v31 = vadd.f32 %v1341_v58, %v1085_v50  ;;  %v765_v60 = vmul.f32 0.0036630037, %v733_v33  ;;  %v1310_v37 = vadd.f32 %v1246_v3, %v2029_v17  ;;  %v220_v0 = vadd.f32 %v1923_v11, %v156_v28 }
  0x33   :  { %v1660_v20 = vadd.f32 %v1628_v26, %v1372_v36  ;;  %v413_v19 = vadd.f32 %v2074_v12, %v348_v47  ;;  %v1598_v54 = vadd.f32 %v1534_v55, %v2005_v45  ;;  %v670_v58 = vadd.f32 %v2078_v2, %v1943_v32  ;;  %v2112_v47 = vld [vmem:[#allocation2 + $0x93] sm:$0xff] }
  0x34   :  { %v1661_v7 = vadd.f32 %v1629_v29, %v1373_v31  ;;  %v1054_v26 = vmul.f32 0.025641026, %v1022_v49  ;;  %v285_v18 = vadd.f32 %v2025_v10, %v220_v0  ;;  %v895_v11 = vadd.f32 %v1955_v44, %v1925_v16 }
  0x35   :  { %v1756_v30 = vadd.f32 %v1724_v41, %v1660_v20  ;;  %v477_v63 = vadd.f32 %v2084_v48, %v413_v19  ;;  %v734_v61 = vadd.f32 %v2087_v38, %v670_v58  ;;  %v1247_v29 = vadd.f32 %v2072_v62, %v2008_v52  ;;  %v2096_v41 = vld [vmem:[#allocation2 + $0x91] sm:$0xff] }
  0x36   :  { %v1757_v23 = vadd.f32 %v1725_v43, %v1661_v7  ;;  %v349_v32 = vadd.f32 %v2040_v42, %v285_v18  ;;  %v959_v46 = vadd.f32 %v895_v11, %v1930_v22  ;;  %v1471_v44 = vadd.f32 %v1972_v57, %v1919_v8  ;;  %v2110_v43 = vld [vmem:[#allocation2 + $0x98] sm:$0xff]  ;;  %v3004_v11 = vld [vmem:[#allocation12_spill] sm:$0xff] }
  0x37   :  { %1788 = vst [vmem:[#allocation5 + $0x8] sm:$0xff] %v1756_v30  ;;  %v157_v50 = vadd.f32 %v1182_v53, %v1985_v13  ;;  %v509_v51 = vmul.f32 0.014652015, %v477_v63  ;;  %v1342_v33 = vmul.f32 0.05860806, %v1310_v37  ;;  %v607_v36 = vadd.f32 %v1988_v15, %v1976_v1  ;;  %v2121_v7 = vld [vmem:[#allocation2 + $0x9c] sm:$0xff] }
  0x38   :  { %1789 = vst [vmem:[#allocation5 + $0x10] sm:$0xff] %v1757_v23  ;;  %v1630_v3 = vmul.f32 0.0952381, %v1598_v54  ;;  %v414_v49 = vadd.f32 %v2096_v41, %v349_v32  ;;  %v1023_v55 = vadd.f32 %v2099_v27, %v959_v46  ;;  %v1535_v28 = vadd.f32 %v1471_v44, %v1921_v9  ;;  %v2131_v32 = vld [vmem:[#allocation2 + $0x99] sm:$0xff] }
  0x39   :  { %v221_v31 = vadd.f32 %v1999_v39, %v157_v50  ;;  %v797_v8 = vadd.f32 %v765_v60, %v509_v51  ;;  %v1311_v53 = vadd.f32 %v1247_v29, %v2023_v6  ;;  %v671_v20 = vadd.f32 %v2110_v43, %v607_v36 }
  0x3a   :  { %v896_v1 = vadd.f32 %v2032_v24, %v1981_v5  ;;  %v478_v15 = vadd.f32 %v2112_v47, %v414_v49  ;;  %v766_v37 = vmul.f32 0.0036630037, %v734_v61  ;;  %v1599_v0 = vadd.f32 %v1535_v28, %v2027_v14  ;;  %v2139_v49 = vld [vmem:[#allocation2 + $0x9b] sm:$0xff]  ;;  %v2143_v28 = vld [vmem:[#allocation2 + $0xa8] sm:$0xff] }
  0x3b   :  { %v286_v9 = vadd.f32 %v2049_v4, %v221_v31  ;;  %v1086_v19 = vadd.f32 %v1054_v26, %v797_v8  ;;  %v735_v60 = vadd.f32 %v2121_v7, %v671_v20  ;;  %v1184_v58 = vadd.f32 %v2015_v59, %v2002_v40  ;;  %v2133_v26 = vld [vmem:[#allocation2 + $0x9a] sm:$0xff] }
  0x3c   :  { %v960_v54 = vadd.f32 %v896_v1, %v1996_v25  ;;  %v510_v30 = vmul.f32 0.014652015, %v478_v15  ;;  %v1055_v18 = vmul.f32 0.025641026, %v1023_v55  ;;  %v1472_v23 = vadd.f32 %v3004_v11, %v2012_v56  ;;  %v3005_v20 = vld [vmem:[#allocation8_spill] sm:$0xff] }
  0x3d   :  { %v350_v24 = vadd.f32 %v2054_v21, %v286_v9  ;;  %v1374_v63 = vadd.f32 %v1342_v33, %v1086_v19  ;;  %v1726_v61 = vmul.f32 0.15018316, %v3004_v11  ;;  %v1343_v29 = vmul.f32 0.05860806, %v1311_v53 }
  0x3e   :  { %v1248_v46 = vadd.f32 %v1184_v58, %v2074_v12  ;;  %v798_v44 = vadd.f32 %v766_v37, %v510_v30  ;;  %v1024_v59 = vadd.f32 %v2133_v26, %v960_v54  ;;  %v1536_v50 = vadd.f32 %v1472_v23, %v2029_v17 }
  0x3f   :  { %v415_v40 = vadd.f32 %v2131_v32, %v350_v24  ;;  %v1662_v51 = vadd.f32 %v1630_v3, %v1374_v63  ;;  %v1631_v36 = vmul.f32 0.0952381, %v1599_v0  ;;  %v767_v33 = vmul.f32 0.0036630037, %v735_v60  ;;  %v2151_v0 = vld [vmem:[#allocation2 + $0xac] sm:$0xff] }
  0x40   :  { %v158_v55 = vadd.f32 %v2072_v62, %v1925_v16  ;;  %v1087_v31 = vadd.f32 %v1055_v18, %v798_v44  ;;  %v1312_v53 = vadd.f32 %v1248_v46, %v2084_v48  ;;  %v672_v1 = vadd.f32 %v2143_v28, %v3005_v20  ;;  %v3006_v18 = vld [vmem:[#allocation9_spill] sm:$0xff] }
  0x41   :  { %v479_v8 = vadd.f32 %v2139_v49, %v415_v40  ;;  %v1758_v15 = vadd.f32 %v1726_v61, %v1662_v51  ;;  %v1600_v3 = vadd.f32 %v1536_v50, %v2061_v34  ;;  %v897_v16 = vadd.f32 %v1972_v57, %v2025_v10  ;;  %v3007_v50 = vld [vmem:[#allocation11_spill] sm:$0xff] }
  0x42   :  { %v222_v37 = vadd.f32 %v1930_v22, %v158_v55  ;;  %v1375_v62 = vadd.f32 %v1343_v29, %v1087_v31  ;;  %v1056_v19 = vmul.f32 0.025641026, %v1024_v59  ;;  %v736_v60 = vadd.f32 %v2151_v0, %v672_v1  ;;  %v2163_v29 = vld [vmem:[#allocation2 + $0xaa] sm:$0xff] }
  0x43   :  { %v511_v9 = vmul.f32 0.014652015, %v479_v8  ;;  %1790 = vst [vmem:[#allocation5 + $0x18] sm:$0xff] %v1758_v15  ;;  %v961_v30 = vadd.f32 %v897_v16, %v2040_v42  ;;  %v1249_v24 = vadd.f32 %v3006_v18, %v2096_v41  ;;  %v1473_v22 = vadd.f32 %v1950_v35, %v2008_v52  ;;  %v2169_v31 = vld [vmem:[#allocation2 + $0xa9] sm:$0xff] }
  0x44   :  { %v287_v54 = vadd.f32 %v2078_v2, %v222_v37  ;;  %v1663_v23 = vadd.f32 %v1631_v36, %v1375_v62  ;;  %v1344_v61 = vmul.f32 0.05860806, %v1312_v53  ;;  %v1728_v57 = vmul.f32 0.15018316, %v2005_v45  ;;  %v2179_v15 = vld [vmem:[#allocation2 + $0xb0] sm:$0xff] }
  0x45   :  { %v799_v63 = vadd.f32 %v767_v33, %v511_v9  ;;  %v1632_v46 = vmul.f32 0.0952381, %v1600_v3  ;;  %v1025_v40 = vadd.f32 %v2163_v29, %v961_v30  ;;  %v1537_v59 = vadd.f32 %v1473_v22, %v2023_v6  ;;  %v2181_v37 = vld [vmem:[#allocation2 + $0xab] sm:$0xff] }
  0x46   :  { %v351_v44 = vadd.f32 %v2087_v38, %v287_v54  ;;  %v1759_v51 = vadd.f32 %v3007_v50, %v1663_v23  ;;  %v159_v36 = vadd.f32 %v1184_v58, %v1981_v5  ;;  %v609_v33 = vadd.f32 %v1999_v39, %v1985_v13 }
  0x47   :  { %v1088_v55 = vadd.f32 %v1056_v19, %v799_v63  ;;  %v768_v53 = vmul.f32 0.0036630037, %v736_v60  ;;  %v1313_v20 = vadd.f32 %v1249_v24, %v2112_v47  ;;  %v2177_v1 = vmul.f32 0.15018316, %v2027_v14  ;;  %v2194_v24 = vld [vmem:[#allocation2 + $0xb4] sm:$0xff] }
  0x48   :  { %v416_v8 = vadd.f32 %v2169_v31, %v351_v44  ;;  %1791 = vst [vmem:[#allocation5 + $0x20] sm:$0xff] %v1759_v51  ;;  %v223_v16 = vadd.f32 %v1996_v25, %v159_v36  ;;  %v673_v58 = vadd.f32 %v2179_v15, %v609_v33  ;;  %v898_v13 = vadd.f32 %v3004_v11, %v2049_v4  ;;  %v2198_v63 = vld [vmem:[#allocation2 + $0xb2] sm:$0xff]  ;;  %v2209_v33 = vld [vmem:[#allocation2 + $0xc0] sm:$0xff] }
  0x49   :  { %v1376_v3 = vadd.f32 %v1344_v61, %v1088_v55  ;;  %v1601_v62 = vadd.f32 %v1537_v59, %v2099_v27  ;;  %v1186_v9 = vadd.f32 %v2029_v17, %v2012_v56  ;;  %v1474_v19 = vadd.f32 %v2005_v45, %v2074_v12  ;;  %v2204_v51 = vld [vmem:[#allocation2 + $0xb1] sm:$0xff] }
  0x4a   :  { %v480_v39 = vadd.f32 %v2181_v37, %v416_v8  ;;  %v1057_v54 = vmul.f32 0.025641026, %v1025_v40  ;;  %v288_v30 = vadd.f32 %v2110_v43, %v223_v16  ;;  %v962_v22 = vadd.f32 %v898_v13, %v2054_v21 }
  0x4b   :  { %v1664_v60 = vadd.f32 %v1632_v46, %v1376_v3  ;;  %v737_v11 = vadd.f32 %v2194_v24, %v673_v58  ;;  %v1250_v61 = vadd.f32 %v1186_v9, %v2131_v32  ;;  %v1538_v56 = vadd.f32 %v1474_v19, %v2084_v48  ;;  %v2217_v58 = vld [vmem:[#allocation2 + $0xb3] sm:$0xff] }
  0x4c   :  { %v512_v23 = vmul.f32 0.014652015, %v480_v39  ;;  %v1345_v44 = vmul.f32 0.05860806, %v1313_v20  ;;  %v352_v46 = vadd.f32 %v2121_v7, %v288_v30  ;;  %v1026_v40 = vadd.f32 %v2198_v63, %v962_v22  ;;  %v3008_v20 = vld [vmem:[#allocation10_spill] sm:$0xff] }
  0x4d   :  { %v1760_v17 = vadd.f32 %v1728_v57, %v1664_v60  ;;  %v1633_v50 = vmul.f32 0.0952381, %v1601_v62  ;;  %v1314_v55 = vadd.f32 %v1250_v61, %v2139_v49  ;;  %v160_v36 = vadd.f32 %v3006_v18, %v2025_v10  ;;  %v2221_v62 = vld [vmem:[#allocation2 + $0xc4] sm:$0xff] }
  0x4e   :  { %v800_v59 = vadd.f32 %v768_v53, %v512_v23  ;;  %v417_v8 = vadd.f32 %v2204_v51, %v352_v46  ;;  %v1602_v57 = vadd.f32 %v1538_v56, %v2133_v26  ;;  %v674_v3 = vadd.f32 %v2209_v33, %v3008_v20  ;;  %v2237_v20 = vld [vmem:[#allocation2 + $0xc2] sm:$0xff] }
  0x4f   :  { %1792 = vst [vmem:[#allocation5 + $0x28] sm:$0xff] %v1760_v17  ;;  %v899_v53 = vadd.f32 %v1950_v35, %v2078_v2  ;;  %v769_v13 = vmul.f32 0.0036630037, %v737_v11  ;;  %v1730_v39 = vmul.f32 0.15018316, %v2061_v34  ;;  %v224_v18 = vadd.f32 %v2040_v42, %v160_v36 }
  0x50   :  { %v1089_v16 = vadd.f32 %v1057_v54, %v800_v59  ;;  %v481_v19 = vadd.f32 %v2217_v58, %v417_v8  ;;  %v1058_v60 = vmul.f32 0.025641026, %v1026_v40  ;;  %v738_v30 = vadd.f32 %v2221_v62, %v674_v3 }
  0x51   :  { %v1187_v22 = vadd.f32 %v2023_v6, %v2008_v52  ;;  %v289_v35 = vadd.f32 %v2143_v28, %v224_v18  ;;  %v963_v54 = vadd.f32 %v899_v53, %v2087_v38  ;;  %v1475_v11 = vadd.f32 %v2027_v14, %v2096_v41  ;;  %v2250_v18 = vld [vmem:[#allocation2 + $0xc3] sm:$0xff] }
  0x52   :  { %v1377_v23 = vadd.f32 %v1345_v44, %v1089_v16  ;;  %v513_v61 = vmul.f32 0.014652015, %v481_v19  ;;  %v1346_v56 = vmul.f32 0.05860806, %v1314_v55  ;;  %v1634_v17 = vmul.f32 0.0952381, %v1602_v57 }
  0x53   :  { %v1251_v46 = vadd.f32 %v1187_v22, %v2169_v31  ;;  %v353_v40 = vadd.f32 %v2151_v0, %v289_v35  ;;  %v1539_v36 = vadd.f32 %v1475_v11, %v2112_v47  ;;  %v161_v52 = vadd.f32 %v1186_v9, %v2049_v4  ;;  %v2235_v44 = vld [vmem:[#allocation2 + $0xc1] sm:$0xff]  ;;  %v2259_v35 = vld [vmem:[#allocation2 + $0xcc] sm:$0xff] }
  0x54   :  { %v1665_v59 = vadd.f32 %v1633_v50, %v1377_v23  ;;  %v801_v6 = vadd.f32 %v769_v13, %v513_v61  ;;  %v770_v8 = vmul.f32 0.0036630037, %v738_v30  ;;  %v2240_v3 = vmul.f32 0.15018316, %v2099_v27  ;;  %v2248_v16 = vld [vmem:[#allocation2 + $0xc8] sm:$0xff] }
  0x55   :  { %v611_v55 = vadd.f32 %v1996_v25, %v1981_v5  ;;  %v418_v57 = vadd.f32 %v2235_v44, %v353_v40  ;;  %v1027_v53 = vadd.f32 %v2237_v20, %v963_v54  ;;  %v225_v9 = vadd.f32 %v2054_v21, %v161_v52 }
  0x56   :  { %v1761_v50 = vadd.f32 %v2177_v1, %v1665_v59  ;;  %v1090_v13 = vadd.f32 %v1058_v60, %v801_v6  ;;  %v1315_v19 = vadd.f32 %v1251_v46, %v2181_v37  ;;  %v900_v5 = vadd.f32 %v2005_v45, %v2110_v43 }
  0x57   :  { %v675_v30 = vadd.f32 %v2248_v16, %v611_v55  ;;  %v482_v25 = vadd.f32 %v2250_v18, %v418_v57  ;;  %v1603_v1 = vadd.f32 %v1539_v36, %v2163_v29  ;;  %v290_v23 = vadd.f32 %v2179_v15, %v225_v9  ;;  %v2268_v36 = vld [vmem:[#allocation2 + $0xca] sm:$0xff] }
  0x58   :  { %1793 = vst [vmem:[#allocation5 + $0x30] sm:$0xff] %v1761_v50  ;;  %v1188_v60 = vadd.f32 %v2084_v48, %v2074_v12  ;;  %v1378_v54 = vadd.f32 %v1346_v56, %v1090_v13  ;;  %v964_v61 = vadd.f32 %v900_v5, %v2121_v7  ;;  %v1476_v45 = vadd.f32 %v2061_v34, %v2131_v32  ;;  %v2271_v50 = vld [vmem:[#allocation2 + $0xc9] sm:$0xff] }
  0x59   :  { %v739_v11 = vadd.f32 %v2259_v35, %v675_v30  ;;  %v514_v46 = vmul.f32 0.014652015, %v482_v25  ;;  %v1059_v59 = vmul.f32 0.025641026, %v1027_v53  ;;  %v354_v40 = vadd.f32 %v2194_v24, %v290_v23  ;;  %v2277_v30 = vld [vmem:[#allocation2 + $0xcb] sm:$0xff] }
  0x5a   :  { %v1252_v52 = vadd.f32 %v1188_v60, %v2204_v51  ;;  %v1666_v6 = vadd.f32 %v1634_v17, %v1378_v54  ;;  %v1347_v55 = vmul.f32 0.05860806, %v1315_v19  ;;  %v1028_v12 = vadd.f32 %v2268_v36, %v964_v61 }
  0x5b   :  { %v1540_v48 = vadd.f32 %v1476_v45, %v2139_v49  ;;  %v802_v56 = vadd.f32 %v770_v8, %v514_v46  ;;  %v1635_v57 = vmul.f32 0.0952381, %v1603_v1  ;;  %v419_v9 = vadd.f32 %v2271_v50, %v354_v40  ;;  %v2284_v1 = vld [vmem:[#allocation2 + $0xd8] sm:$0xff] }
  0x5c   :  { %v162_v53 = vadd.f32 %v1187_v22, %v2078_v2  ;;  %v1762_v13 = vadd.f32 %v1730_v39, %v1666_v6  ;;  %v771_v5 = vmul.f32 0.0036630037, %v739_v11  ;;  %v1316_v25 = vadd.f32 %v1252_v52, %v2217_v58  ;;  %v2293_v46 = vld [vmem:[#allocation2 + $0xdc] sm:$0xff] }
  0x5d   :  { %v612_v17 = vadd.f32 %v2040_v42, %v2025_v10  ;;  %v1091_v19 = vadd.f32 %v1059_v59, %v802_v56  ;;  %v483_v23 = vadd.f32 %v2277_v30, %v419_v9  ;;  %v1060_v54 = vmul.f32 0.025641026, %v1028_v12 }
  0x5e   :  { %v226_v8 = vadd.f32 %v2087_v38, %v162_v53  ;;  %1794 = vst [vmem:[#allocation5 + $0x38] sm:$0xff] %v1762_v13  ;;  %v1604_v22 = vadd.f32 %v1540_v48, %v2198_v63  ;;  %v901_v11 = vadd.f32 %v2027_v14, %v2143_v28  ;;  %v1189_v61 = vadd.f32 %v2112_v47, %v2096_v41  ;;  %v2301_v47 = vld [vmem:[#allocation2 + $0xda] sm:$0xff] }
  0x5f   :  { %v676_v39 = vadd.f32 %v2284_v1, %v612_v17  ;;  %v1379_v10 = vadd.f32 %v1347_v55, %v1091_v19  ;;  %v515_v42 = vmul.f32 0.014652015, %v483_v23  ;;  %v1477_v59 = vadd.f32 %v2099_v27, %v2169_v31  ;;  %v2305_v53 = vld [vmem:[#allocation2 + $0xd9] sm:$0xff] }
  0x60   :  { %v291_v45 = vadd.f32 %v2209_v33, %v226_v8  ;;  %v1348_v40 = vmul.f32 0.05860806, %v1316_v25  ;;  %v965_v6 = vadd.f32 %v901_v11, %v2151_v0  ;;  %v1253_v12 = vadd.f32 %v1189_v61, %v2235_v44  ;;  %v2312_v23 = vld [vmem:[#allocation2 + $0xdb] sm:$0xff] }
  0x61   :  { %v740_v52 = vadd.f32 %v2293_v46, %v676_v39  ;;  %v1667_v14 = vadd.f32 %v1635_v57, %v1379_v10  ;;  %v803_v48 = vadd.f32 %v771_v5, %v515_v42  ;;  %v1541_v55 = vadd.f32 %v1477_v59, %v2181_v37 }
  0x62   :  { %v355_v41 = vadd.f32 %v2221_v62, %v291_v45  ;;  %v1636_v56 = vmul.f32 0.0952381, %v1604_v22  ;;  %v1732_v9 = vmul.f32 0.15018316, %v2133_v26  ;;  %v1029_v13 = vadd.f32 %v2301_v47, %v965_v6 }
  0x63   :  { %v163_v25 = vadd.f32 %v1188_v60, %v2110_v43  ;;  %v1763_v17 = vadd.f32 %v2240_v3, %v1667_v14  ;;  %v1092_v19 = vadd.f32 %v1060_v54, %v803_v48  ;;  %v1317_v5 = vadd.f32 %v1253_v12, %v2250_v18  ;;  %v2319_v54 = vld [vmem:[#allocation2 + $0xe0] sm:$0xff] }
  0x64   :  { %v420_v57 = vadd.f32 %v2305_v53, %v355_v41  ;;  %v772_v8 = vmul.f32 0.0036630037, %v740_v52  ;;  %v1605_v22 = vadd.f32 %v1541_v55, %v2237_v20  ;;  %v613_v11 = vadd.f32 %v2054_v21, %v2049_v4  ;;  %v2329_v12 = vld [vmem:[#allocation2 + $0xe4] sm:$0xff] }
  0x65   :  { %v227_v39 = vadd.f32 %v2121_v7, %v163_v25  ;;  %1795 = vst [vmem:[#allocation5 + $0x40] sm:$0xff] %v1763_v17  ;;  %v1380_v10 = vadd.f32 %v1348_v40, %v1092_v19  ;;  %v1061_v3 = vmul.f32 0.025641026, %v1029_v13  ;;  %v902_v42 = vadd.f32 %v2061_v34, %v2179_v15  ;;  %v2334_v41 = vld [vmem:[#allocation2 + $0xe2] sm:$0xff] }
  0x66   :  { %v484_v60 = vadd.f32 %v2312_v23, %v420_v57  ;;  %v677_v59 = vadd.f32 %v2319_v54, %v613_v11  ;;  %v1190_v52 = vadd.f32 %v2139_v49, %v2131_v32  ;;  %v1478_v4 = vadd.f32 %v2133_v26, %v2204_v51  ;;  %v2338_v25 = vld [vmem:[#allocation2 + $0xe1] sm:$0xff] }
  0x67   :  { %v292_v45 = vadd.f32 %v2248_v16, %v227_v39  ;;  %v1668_v21 = vadd.f32 %v1636_v56, %v1380_v10  ;;  %v1349_v6 = vmul.f32 0.05860806, %v1317_v5  ;;  %v966_v14 = vadd.f32 %v902_v42, %v2194_v24  ;;  %v2345_v10 = vld [vmem:[#allocation2 + $0xe3] sm:$0xff] }
  0x68   :  { %v516_v40 = vmul.f32 0.014652015, %v484_v60  ;;  %v741_v34 = vadd.f32 %v2329_v12, %v677_v59  ;;  %v1254_v55 = vadd.f32 %v1190_v52, %v2271_v50  ;;  %v1542_v32 = vadd.f32 %v1478_v4, %v2217_v58 }
  0x69   :  { %v356_v48 = vadd.f32 %v2259_v35, %v292_v45  ;;  %v1764_v49 = vadd.f32 %v1732_v9, %v1668_v21  ;;  %v1030_v56 = vadd.f32 %v2334_v41, %v966_v14  ;;  %v164_v17 = vadd.f32 %v1189_v61, %v2143_v28  ;;  %v2352_v45 = vld [vmem:[#allocation2 + $0xf0] sm:$0xff] }
  0x6a   :  { %v804_v13 = vadd.f32 %v772_v8, %v516_v40  ;;  %v1637_v19 = vmul.f32 0.0952381, %v1605_v22  ;;  %v1733_v57 = vmul.f32 0.15018316, %v2163_v29  ;;  %v1318_v39 = vadd.f32 %v1254_v55, %v2277_v30 }
  0x6b   :  { %v421_v5 = vadd.f32 %v2338_v25, %v356_v48  ;;  %1796 = vst [vmem:[#allocation5 + $0x48] sm:$0xff] %v1764_v49  ;;  %v773_v60 = vmul.f32 0.0036630037, %v741_v34  ;;  %v228_v9 = vadd.f32 %v2151_v0, %v164_v17  ;;  %v614_v8 = vadd.f32 %v2087_v38, %v2078_v2  ;;  %v2360_v38 = vld [vmem:[#allocation2 + $0xf4] sm:$0xff] }
  0x6c   :  { %v1093_v11 = vadd.f32 %v1061_v3, %v804_v13  ;;  %v1062_v61 = vmul.f32 0.025641026, %v1030_v56  ;;  %v1606_v22 = vadd.f32 %v1542_v32, %v2268_v36  ;;  %v903_v59 = vadd.f32 %v2099_v27, %v2209_v33  ;;  %v2367_v32 = vld [vmem:[#allocation2 + $0xf2] sm:$0xff] }
  0x6d   :  { %v485_v42 = vadd.f32 %v2345_v10, %v421_v5  ;;  %v293_v3 = vadd.f32 %v2284_v1, %v228_v9  ;;  %v678_v21 = vadd.f32 %v2352_v45, %v614_v8  ;;  %v1191_v40 = vadd.f32 %v2181_v37, %v2169_v31  ;;  %v2370_v31 = vld [vmem:[#allocation2 + $0xf1] sm:$0xff] }
  0x6e   :  { %v1381_v4 = vadd.f32 %v1349_v6, %v1093_v11  ;;  %v1350_v2 = vmul.f32 0.05860806, %v1318_v39  ;;  %v967_v48 = vadd.f32 %v903_v59, %v2221_v62  ;;  %v1479_v34 = vadd.f32 %v2163_v29, %v2235_v44  ;;  %v2377_v8 = vld [vmem:[#allocation2 + $0xf3] sm:$0xff] }
  0x6f   :  { %v517_v14 = vmul.f32 0.014652015, %v485_v42  ;;  %v357_v27 = vadd.f32 %v2293_v46, %v293_v3  ;;  %v742_v6 = vadd.f32 %v2360_v38, %v678_v21  ;;  %v1255_v49 = vadd.f32 %v1191_v40, %v2305_v53 }
  0x70   :  { %v1669_v55 = vadd.f32 %v1637_v19, %v1381_v4  ;;  %v1031_v37 = vadd.f32 %v2367_v32, %v967_v48  ;;  %v1543_v56 = vadd.f32 %v1479_v34, %v2250_v18  ;;  %v165_v17 = vadd.f32 %v1190_v52, %v2179_v15 }
  0x71   :  { %v805_v13 = vadd.f32 %v773_v60, %v517_v14  ;;  %v1638_v39 = vmul.f32 0.0952381, %v1606_v22  ;;  %v1734_v19 = vmul.f32 0.15018316, %v2198_v63  ;;  %v422_v11 = vadd.f32 %v2370_v31, %v357_v27  ;;  %v2388_v14 = vld [vmem:[#allocation2 + $0xf8] sm:$0xff] }
  0x72   :  { %v1765_v5 = vadd.f32 %v1733_v57, %v1669_v55  ;;  %v774_v42 = vmul.f32 0.0036630037, %v742_v6  ;;  %v1319_v60 = vadd.f32 %v1255_v49, %v2312_v23  ;;  %v229_v59 = vadd.f32 %v2194_v24, %v165_v17  ;;  %v2397_v6 = vld [vmem:[#allocation2 + $0xfc] sm:$0xff] }
  0x73   :  { %v1094_v9 = vadd.f32 %v1062_v61, %v805_v13  ;;  %v486_v4 = vadd.f32 %v2377_v8, %v422_v11  ;;  %v1063_v3 = vmul.f32 0.025641026, %v1031_v37  ;;  %v615_v52 = vadd.f32 %v2121_v7, %v2110_v43  ;;  %v2399_v49 = vld [vmem:[#allocation2 + $0xfa] sm:$0xff] }
  0x74   :  { %1797 = vst [vmem:[#allocation5 + $0x50] sm:$0xff] %v1765_v5  ;;  %v904_v57 = vadd.f32 %v2133_v26, %v2248_v16  ;;  %v1607_v61 = vadd.f32 %v1543_v56, %v2301_v47  ;;  %v294_v21 = vadd.f32 %v2319_v54, %v229_v59  ;;  %v1192_v48 = vadd.f32 %v2217_v58, %v2204_v51  ;;  %v2402_v51 = vld [vmem:[#allocation2 + $0xf9] sm:$0xff] }
  0x75   :  { %v1382_v22 = vadd.f32 %v1350_v2, %v1094_v9  ;;  %v518_v34 = vmul.f32 0.014652015, %v486_v4  ;;  %v679_v55 = vadd.f32 %v2388_v14, %v615_v52  ;;  %v1480_v43 = vadd.f32 %v2198_v63, %v2271_v50  ;;  %v2410_v4 = vld [vmem:[#allocation2 + $0xfb] sm:$0xff] }
  0x76   :  { %v968_v27 = vadd.f32 %v904_v57, %v2259_v35  ;;  %v1351_v26 = vmul.f32 0.05860806, %v1319_v60  ;;  %v358_v2 = vadd.f32 %v2329_v12, %v294_v21  ;;  %v1256_v13 = vadd.f32 %v1192_v48, %v2338_v25 }
  0x77   :  { %v1670_v7 = vadd.f32 %v1638_v39, %v1382_v22  ;;  %v806_v37 = vadd.f32 %v774_v42, %v518_v34  ;;  %v743_v58 = vadd.f32 %v2397_v6, %v679_v55  ;;  %v1544_v17 = vadd.f32 %v1480_v43, %v2277_v30 }
  0x78   :  { %v1032_v56 = vadd.f32 %v2399_v49, %v968_v27  ;;  %v1735_v39 = vmul.f32 0.15018316, %v2237_v20  ;;  %v423_v11 = vadd.f32 %v2402_v51, %v358_v2  ;;  %v166_v9 = vadd.f32 %v1191_v40, %v2209_v33  ;;  %v2418_v40 = vld [vmem:[#allocation2 + $0x108] sm:$0xff] }
  0x79   :  { %v1766_v5 = vadd.f32 %v1734_v19, %v1670_v7  ;;  %v1095_v60 = vadd.f32 %v1063_v3, %v806_v37  ;;  %v1639_v59 = vmul.f32 0.0952381, %v1607_v61  ;;  %v775_v42 = vmul.f32 0.0036630037, %v743_v58 }
  0x7a   :  { %v1320_v52 = vadd.f32 %v1256_v13, %v2345_v10  ;;  %v487_v57 = vadd.f32 %v2410_v4, %v423_v11  ;;  %v1064_v22 = vmul.f32 0.025641026, %v1032_v56  ;;  %v230_v21 = vadd.f32 %v2221_v62, %v166_v9  ;;  %v2438_v11 = vld [vmem:[#allocation2 + $0x109] sm:$0xff] }
  0x7b   :  { %1798 = vst [vmem:[#allocation5 + $0x58] sm:$0xff] %v1766_v5  ;;  %v616_v19 = vadd.f32 %v2151_v0, %v2143_v28  ;;  %v1383_v34 = vadd.f32 %v1351_v26, %v1095_v60  ;;  %v1608_v55 = vadd.f32 %v1544_v17, %v2334_v41  ;;  %v905_v3 = vadd.f32 %v2163_v29, %v2284_v1  ;;  %v2428_v26 = vld [vmem:[#allocation2 + $0x10c] sm:$0xff] }
  0x7c   :  { %v1193_v61 = vadd.f32 %v2250_v18, %v2235_v44  ;;  %v519_v27 = vmul.f32 0.014652015, %v487_v57  ;;  %v295_v43 = vadd.f32 %v2352_v45, %v230_v21  ;;  %v1481_v2 = vadd.f32 %v2237_v20, %v2305_v53  ;;  %v2434_v18 = vld [vmem:[#allocation2 + $0x10a] sm:$0xff] }
  0x7d   :  { %v680_v7 = vadd.f32 %v2418_v40, %v616_v19  ;;  %v1671_v28 = vadd.f32 %v1639_v59, %v1383_v34  ;;  %v1352_v0 = vmul.f32 0.05860806, %v1320_v52  ;;  %v969_v13 = vadd.f32 %v905_v3, %v2293_v46  ;;  %v2444_v21 = vld [vmem:[#allocation2 + $0x10b] sm:$0xff] }
  0x7e   :  { %v1257_v37 = vadd.f32 %v1193_v61, %v2370_v31  ;;  %v807_v29 = vadd.f32 %v775_v42, %v519_v27  ;;  %v359_v58 = vadd.f32 %v2360_v38, %v295_v43  ;;  %v1545_v56 = vadd.f32 %v1481_v2, %v2312_v23 }
  0x7f   :  { %v744_v44 = vadd.f32 %v2428_v26, %v680_v7  ;;  %v1767_v17 = vadd.f32 %v1735_v39, %v1671_v28  ;;  %v1736_v5 = vmul.f32 0.15018316, %v2268_v36  ;;  %v1033_v9 = vadd.f32 %v2434_v18, %v969_v13 }
  0x80   :  { %v167_v60 = vadd.f32 %v1192_v48, %v2248_v16  ;;  %v1096_v59 = vadd.f32 %v1064_v22, %v807_v29  ;;  %v1640_v52 = vmul.f32 0.0952381, %v1608_v55  ;;  %v424_v42 = vadd.f32 %v2438_v11, %v359_v58  ;;  %v2451_v55 = vld [vmem:[#allocation2 + $0x110] sm:$0xff] }
  0x81   :  { %v1321_v57 = vadd.f32 %v1257_v37, %v2377_v8  ;;  %1799 = vst [vmem:[#allocation5 + $0x60] sm:$0xff] %v1767_v17  ;;  %v776_v19 = vmul.f32 0.0036630037, %v744_v44  ;;  %v1609_v39 = vadd.f32 %v1545_v56, %v2367_v32  ;;  %v617_v3 = vadd.f32 %v2194_v24, %v2179_v15  ;;  %v2461_v37 = vld [vmem:[#allocation2 + $0x114] sm:$0xff] }
  0x82   :  { %v231_v34 = vadd.f32 %v2259_v35, %v167_v60  ;;  %v1384_v27 = vadd.f32 %v1352_v0, %v1096_v59  ;;  %v488_v48 = vadd.f32 %v2444_v21, %v424_v42  ;;  %v1065_v22 = vmul.f32 0.025641026, %v1033_v9  ;;  %v2466_v44 = vld [vmem:[#allocation2 + $0x112] sm:$0xff] }
  0x83   :  { %v906_v43 = vadd.f32 %v2198_v63, %v2319_v54  ;;  %v681_v2 = vadd.f32 %v2451_v55, %v617_v3  ;;  %v1194_v28 = vadd.f32 %v2277_v30, %v2271_v50  ;;  %v1482_v13 = vadd.f32 %v2268_v36, %v2338_v25  ;;  %v2470_v9 = vld [vmem:[#allocation2 + $0x111] sm:$0xff] }
  0x84   :  { %v296_v7 = vadd.f32 %v2388_v14, %v231_v34  ;;  %v1672_v15 = vadd.f32 %v1640_v52, %v1384_v27  ;;  %v520_v24 = vmul.f32 0.014652015, %v488_v48  ;;  %v1353_v0 = vmul.f32 0.05860806, %v1321_v57  ;;  %v2477_v27 = vld [vmem:[#allocation2 + $0x113] sm:$0xff] }
  0x85   :  { %v970_v29 = vadd.f32 %v906_v43, %v2329_v12  ;;  %v745_v63 = vadd.f32 %v2461_v37, %v681_v2  ;;  %v1258_v56 = vadd.f32 %v1194_v28, %v2402_v51  ;;  %v1546_v50 = vadd.f32 %v1482_v13, %v2345_v10 }
  0x86   :  { %v360_v58 = vadd.f32 %v2397_v6, %v296_v7  ;;  %v1768_v30 = vadd.f32 %v1736_v5, %v1672_v15  ;;  %v808_v17 = vadd.f32 %v776_v19, %v520_v24  ;;  %v168_v59 = vadd.f32 %v1193_v61, %v2284_v1  ;;  %v2484_v7 = vld [vmem:[#allocation2 + $0x120] sm:$0xff] }
  0x87   :  { %v1034_v60 = vadd.f32 %v2466_v44, %v970_v29  ;;  %v1641_v52 = vmul.f32 0.0952381, %v1609_v39  ;;  %v1737_v42 = vmul.f32 0.15018316, %v2301_v47  ;;  %v1322_v34 = vadd.f32 %v1258_v56, %v2410_v4 }
  0x88   :  { %v425_v57 = vadd.f32 %v2470_v9, %v360_v58  ;;  %1800 = vst [vmem:[#allocation5 + $0x68] sm:$0xff] %v1768_v30  ;;  %v1097_v3 = vadd.f32 %v1065_v22, %v808_v17  ;;  %v777_v48 = vmul.f32 0.0036630037, %v745_v63  ;;  %v232_v5 = vadd.f32 %v2293_v46, %v168_v59 }
  0x89   :  { %v618_v19 = vadd.f32 %v2221_v62, %v2209_v33  ;;  %v1066_v61 = vmul.f32 0.025641026, %v1034_v60  ;;  %v1610_v39 = vadd.f32 %v1546_v50, %v2399_v49  ;;  %v907_v2 = vadd.f32 %v2237_v20, %v2352_v45  ;;  %v2492_v62 = vld [vmem:[#allocation2 + $0x124] sm:$0xff] }
  0x8a   :  { %v489_v43 = vadd.f32 %v2477_v27, %v425_v57  ;;  %v1385_v13 = vadd.f32 %v1353_v0, %v1097_v3  ;;  %v297_v22 = vadd.f32 %v2418_v40, %v232_v5  ;;  %v1195_v24 = vadd.f32 %v2312_v23, %v2305_v53  ;;  %v2499_v50 = vld [vmem:[#allocation2 + $0x122] sm:$0xff] }
  0x8b   :  { %v682_v15 = vadd.f32 %v2484_v7, %v618_v19  ;;  %v1354_v33 = vmul.f32 0.05860806, %v1322_v34  ;;  %v971_v58 = vadd.f32 %v907_v2, %v2360_v38  ;;  %v1483_v63 = vadd.f32 %v2301_v47, %v2370_v31  ;;  %v2502_v53 = vld [vmem:[#allocation2 + $0x121] sm:$0xff] }
  0x8c   :  { %v521_v29 = vmul.f32 0.014652015, %v489_v43  ;;  %v1673_v56 = vadd.f32 %v1641_v52, %v1385_v13  ;;  %v361_v20 = vadd.f32 %v2428_v26, %v297_v22  ;;  %v1259_v30 = vadd.f32 %v1195_v24, %v2438_v11  ;;  %v2509_v19 = vld [vmem:[#allocation2 + $0x123] sm:$0xff] }
  0x8d   :  { %v746_v0 = vadd.f32 %v2492_v62, %v682_v15  ;;  %v1035_v23 = vadd.f32 %v2499_v50, %v971_v58  ;;  %v1547_v60 = vadd.f32 %v1483_v63, %v2377_v8  ;;  %v169_v59 = vadd.f32 %v1194_v28, %v2319_v54 }
  0x8e   :  { %v809_v17 = vadd.f32 %v777_v48, %v521_v29  ;;  %v1769_v57 = vadd.f32 %v1737_v42, %v1673_v56  ;;  %v1642_v34 = vmul.f32 0.0952381, %v1610_v39  ;;  %v1738_v52 = vmul.f32 0.15018316, %v2334_v41  ;;  %v2520_v29 = vld [vmem:[#allocation2 + $0x128] sm:$0xff] }
  0x8f   :  { %v426_v3 = vadd.f32 %v2502_v53, %v361_v20  ;;  %v778_v43 = vmul.f32 0.0036630037, %v746_v0  ;;  %v1323_v48 = vadd.f32 %v1259_v30, %v2444_v21  ;;  %v233_v2 = vadd.f32 %v2329_v12, %v169_v59  ;;  %v2529_v0 = vld [vmem:[#allocation2 + $0x12c] sm:$0xff] }
  0x90   :  { %v1098_v5 = vadd.f32 %v1066_v61, %v809_v17  ;;  %1801 = vst [vmem:[#allocation5 + $0x70] sm:$0xff] %v1769_v57  ;;  %v1067_v22 = vmul.f32 0.025641026, %v1035_v23  ;;  %v619_v28 = vadd.f32 %v2259_v35, %v2248_v16  ;;  %v908_v42 = vadd.f32 %v2268_v36, %v2388_v14  ;;  %v2531_v30 = vld [vmem:[#allocation2 + $0x12a] sm:$0xff] }
  0x91   :  { %v490_v13 = vadd.f32 %v2509_v19, %v426_v3  ;;  %v1611_v61 = vadd.f32 %v1547_v60, %v2434_v18  ;;  %v298_v15 = vadd.f32 %v2451_v55, %v233_v2  ;;  %v1196_v58 = vadd.f32 %v2345_v10, %v2338_v25  ;;  %v2534_v25 = vld [vmem:[#allocation2 + $0x129] sm:$0xff] }
  0x92   :  { %v1386_v39 = vadd.f32 %v1354_v33, %v1098_v5  ;;  %v683_v56 = vadd.f32 %v2520_v29, %v619_v28  ;;  %v972_v20 = vadd.f32 %v908_v42, %v2397_v6  ;;  %v1484_v16 = vadd.f32 %v2334_v41, %v2402_v51 }
  0x93   :  { %v522_v63 = vmul.f32 0.014652015, %v490_v13  ;;  %v1355_v36 = vmul.f32 0.05860806, %v1323_v48  ;;  %v362_v33 = vadd.f32 %v2461_v37, %v298_v15  ;;  %v1260_v17 = vadd.f32 %v1196_v58, %v2470_v9  ;;  %v2542_v13 = vld [vmem:[#allocation2 + $0x12b] sm:$0xff] }
  0x94   :  { %v1674_v35 = vadd.f32 %v1642_v34, %v1386_v39  ;;  %v747_v10 = vadd.f32 %v2529_v0, %v683_v56  ;;  %v1036_v60 = vadd.f32 %v2531_v30, %v972_v20  ;;  %v1548_v59 = vadd.f32 %v1484_v16, %v2410_v4 }
  0x95   :  { %v810_v23 = vadd.f32 %v778_v43, %v522_v63  ;;  %v1739_v34 = vmul.f32 0.15018316, %v2367_v32  ;;  %v427_v3 = vadd.f32 %v2534_v25, %v362_v33  ;;  %v170_v5 = vadd.f32 %v1195_v24, %v2352_v45  ;;  %v2550_v24 = vld [vmem:[#allocation2 + $0x138] sm:$0xff] }
  0x96   :  { %v1770_v57 = vadd.f32 %v1738_v52, %v1674_v35  ;;  %v1643_v2 = vmul.f32 0.0952381, %v1611_v61  ;;  %v779_v43 = vmul.f32 0.0036630037, %v747_v10  ;;  %v1324_v28 = vadd.f32 %v1260_v17, %v2477_v27 }
  0x97   :  { %v1099_v48 = vadd.f32 %v1067_v22, %v810_v23  ;;  %v491_v42 = vadd.f32 %v2542_v13, %v427_v3  ;;  %v1068_v39 = vmul.f32 0.025641026, %v1036_v60  ;;  %v234_v15 = vadd.f32 %v2360_v38, %v170_v5  ;;  %v2570_v3 = vld [vmem:[#allocation2 + $0x139] sm:$0xff] }
  0x98   :  { %1802 = vst [vmem:[#allocation5 + $0x78] sm:$0xff] %v1770_v57  ;;  %v620_v52 = vadd.f32 %v2293_v46, %v2284_v1  ;;  %v1612_v56 = vadd.f32 %v1548_v59, %v2466_v44  ;;  %v909_v22 = vadd.f32 %v2301_v47, %v2418_v40  ;;  %v1197_v61 = vadd.f32 %v2377_v8, %v2370_v31  ;;  %v2566_v8 = vld [vmem:[#allocation2 + $0x13a] sm:$0xff] }
  0x99   :  { %v1387_v63 = vadd.f32 %v1355_v36, %v1099_v48  ;;  %v523_v20 = vmul.f32 0.014652015, %v491_v42  ;;  %v299_v16 = vadd.f32 %v2484_v7, %v234_v15  ;;  %v1485_v33 = vadd.f32 %v2367_v32, %v2438_v11  ;;  %v2560_v36 = vld [vmem:[#allocation2 + $0x13c] sm:$0xff] }
  0x9a   :  { %v684_v35 = vadd.f32 %v2550_v24, %v620_v52  ;;  %v1356_v46 = vmul.f32 0.05860806, %v1324_v28  ;;  %v973_v17 = vadd.f32 %v909_v22, %v2428_v26  ;;  %v1261_v23 = vadd.f32 %v1197_v61, %v2502_v53  ;;  %v2576_v15 = vld [vmem:[#allocation2 + $0x13b] sm:$0xff] }
  0x9b   :  { %v1675_v1 = vadd.f32 %v1643_v2, %v1387_v63  ;;  %v811_v47 = vadd.f32 %v779_v43, %v523_v20  ;;  %v363_v10 = vadd.f32 %v2492_v62, %v299_v16  ;;  %v1549_v60 = vadd.f32 %v1485_v33, %v2444_v21 }
  0x9c   :  { %v748_v31 = vadd.f32 %v2560_v36, %v684_v35  ;;  %v1740_v57 = vmul.f32 0.15018316, %v2399_v49  ;;  %v1037_v5 = vadd.f32 %v2566_v8, %v973_v17  ;;  %v171_v48 = vadd.f32 %v1196_v58, %v2388_v14 }
  0x9d   :  { %v1771_v59 = vadd.f32 %v1739_v34, %v1675_v1  ;;  %v1100_v2 = vadd.f32 %v1068_v39, %v811_v47  ;;  %v1644_v28 = vmul.f32 0.0952381, %v1612_v56  ;;  %v428_v43 = vadd.f32 %v2570_v3, %v363_v10  ;;  %v2583_v56 = vld [vmem:[#allocation2 + $0x140] sm:$0xff] }
  0x9e   :  { %v1325_v42 = vadd.f32 %v1261_v23, %v2509_v19  ;;  %v780_v52 = vmul.f32 0.0036630037, %v748_v31  ;;  %v1613_v34 = vadd.f32 %v1549_v60, %v2499_v50  ;;  %v235_v63 = vadd.f32 %v2397_v6, %v171_v48  ;;  %v2593_v23 = vld [vmem:[#allocation2 + $0x144] sm:$0xff] }
  0x9f   :  { %1803 = vst [vmem:[#allocation5 + $0x80] sm:$0xff] %v1771_v59  ;;  %v621_v22 = vadd.f32 %v2329_v12, %v2319_v54  ;;  %v1388_v20 = vadd.f32 %v1356_v46, %v1100_v2  ;;  %v492_v58 = vadd.f32 %v2576_v15, %v428_v43  ;;  %v1069_v39 = vmul.f32 0.025641026, %v1037_v5  ;;  %v2598_v31 = vld [vmem:[#allocation2 + $0x142] sm:$0xff] }
  0xa0   :  { %v910_v16 = vadd.f32 %v2334_v41, %v2451_v55  ;;  %v300_v35 = vadd.f32 %v2520_v29, %v235_v63  ;;  %v1198_v1 = vadd.f32 %v2410_v4, %v2402_v51  ;;  %v1486_v17 = vadd.f32 %v2399_v49, %v2470_v9  ;;  %v2602_v5 = vld [vmem:[#allocation2 + $0x141] sm:$0xff] }
  0xa1   :  { %v685_v33 = vadd.f32 %v2583_v56, %v621_v22  ;;  %v1676_v54 = vadd.f32 %v1644_v28, %v1388_v20  ;;  %v524_v12 = vmul.f32 0.014652015, %v492_v58  ;;  %v1357_v46 = vmul.f32 0.05860806, %v1325_v42  ;;  %v2609_v20 = vld [vmem:[#allocation2 + $0x143] sm:$0xff] }
  0xa2   :  { %v974_v47 = vadd.f32 %v910_v16, %v2461_v37  ;;  %v364_v10 = vadd.f32 %v2529_v0, %v300_v35  ;;  %v1262_v60 = vadd.f32 %v1198_v1, %v2534_v25  ;;  %v1550_v51 = vadd.f32 %v1486_v17, %v2477_v27  ;;  %v2616_v35 = vld [vmem:[#allocation2 + $0x150] sm:$0xff] }
  0xa3   :  { %v749_v41 = vadd.f32 %v2593_v23, %v685_v33  ;;  %v1772_v4 = vadd.f32 %v1740_v57, %v1676_v54  ;;  %v812_v59 = vadd.f32 %v780_v52, %v524_v12  ;;  %v172_v2 = vadd.f32 %v1197_v61, %v2418_v40 }
  0xa4   :  { %v1038_v48 = vadd.f32 %v2598_v31, %v974_v47  ;;  %v1645_v28 = vmul.f32 0.0952381, %v1613_v34  ;;  %v1741_v43 = vmul.f32 0.15018316, %v2434_v18  ;;  %v429_v42 = vadd.f32 %v2602_v5, %v364_v10 }
  0xa5   :  { %v1326_v63 = vadd.f32 %v1262_v60, %v2542_v13  ;;  %1804 = vst [vmem:[#allocation5 + $0x88] sm:$0xff] %v1772_v4  ;;  %v1101_v22 = vadd.f32 %v1069_v39, %v812_v59  ;;  %v781_v58 = vmul.f32 0.0036630037, %v749_v41  ;;  %v236_v57 = vadd.f32 %v2428_v26, %v172_v2 }
  0xa6   :  { %v622_v52 = vadd.f32 %v2360_v38, %v2352_v45  ;;  %v493_v16 = vadd.f32 %v2609_v20, %v429_v42  ;;  %v1070_v61 = vmul.f32 0.025641026, %v1038_v48  ;;  %v1614_v34 = vadd.f32 %v1550_v51, %v2531_v30  ;;  %v2624_v38 = vld [vmem:[#allocation2 + $0x154] sm:$0xff] }
  0xa7   :  { %v911_v33 = vadd.f32 %v2367_v32, %v2484_v7  ;;  %v1389_v17 = vadd.f32 %v1357_v46, %v1101_v22  ;;  %v301_v39 = vadd.f32 %v2550_v24, %v236_v57  ;;  %v1199_v12 = vadd.f32 %v2444_v21, %v2438_v11  ;;  %v2631_v51 = vld [vmem:[#allocation2 + $0x152] sm:$0xff] }
  0xa8   :  { %v686_v54 = vadd.f32 %v2616_v35, %v622_v52  ;;  %v525_v47 = vmul.f32 0.014652015, %v493_v16  ;;  %v1358_v45 = vmul.f32 0.05860806, %v1326_v63  ;;  %v1487_v41 = vadd.f32 %v2434_v18, %v2502_v53  ;;  %v2634_v11 = vld [vmem:[#allocation2 + $0x151] sm:$0xff] }
  0xa9   :  { %v975_v10 = vadd.f32 %v911_v33, %v2492_v62  ;;  %v1677_v60 = vadd.f32 %v1645_v28, %v1389_v17  ;;  %v365_v32 = vadd.f32 %v2560_v36, %v301_v39  ;;  %v1263_v4 = vadd.f32 %v1199_v12, %v2570_v3  ;;  %v2641_v52 = vld [vmem:[#allocation2 + $0x153] sm:$0xff] }
  0xaa   :  { %v750_v46 = vadd.f32 %v2624_v38, %v686_v54  ;;  %v813_v59 = vadd.f32 %v781_v58, %v525_v47  ;;  %v1551_v48 = vadd.f32 %v1487_v41, %v2509_v19  ;;  %v173_v2 = vadd.f32 %v1198_v1, %v2451_v55  ;;  %v2652_v47 = vld [vmem:[#allocation2 + $0x158] sm:$0xff] }
  0xab   :  { %v1039_v21 = vadd.f32 %v2631_v51, %v975_v10  ;;  %v1773_v42 = vadd.f32 %v1741_v43, %v1677_v60  ;;  %v1646_v63 = vmul.f32 0.0952381, %v1614_v34  ;;  %v1742_v28 = vmul.f32 0.15018316, %v2466_v44 }
  0xac   :  { %v430_v22 = vadd.f32 %v2634_v11, %v365_v32  ;;  %v1102_v57 = vadd.f32 %v1070_v61, %v813_v59  ;;  %v782_v16 = vmul.f32 0.0036630037, %v750_v46  ;;  %v1327_v58 = vadd.f32 %v1263_v4, %v2576_v15  ;;  %v2661_v46 = vld [vmem:[#allocation2 + $0x15c] sm:$0xff] }
  0xad   :  { %v237_v33 = vadd.f32 %v2461_v37, %v173_v2  ;;  %1805 = vst [vmem:[#allocation5 + $0x90] sm:$0xff] %v1773_v42  ;;  %v1071_v39 = vmul.f32 0.025641026, %v1039_v21  ;;  %v623_v1 = vadd.f32 %v2397_v6, %v2388_v14  ;;  %v912_v43 = vadd.f32 %v2399_v49, %v2520_v29  ;;  %v2663_v4 = vld [vmem:[#allocation2 + $0x15a] sm:$0xff] }
  0xae   :  { %v494_v17 = vadd.f32 %v2641_v52, %v430_v22  ;;  %v1390_v34 = vadd.f32 %v1358_v45, %v1102_v57  ;;  %v1615_v61 = vadd.f32 %v1551_v48, %v2566_v8  ;;  %v1200_v10 = vadd.f32 %v2477_v27, %v2470_v9  ;;  %v2666_v9 = vld [vmem:[#allocation2 + $0x159] sm:$0xff] }
  0xaf   :  { %v302_v54 = vadd.f32 %v2583_v56, %v237_v33  ;;  %v687_v60 = vadd.f32 %v2652_v47, %v623_v1  ;;  %v976_v32 = vadd.f32 %v912_v43, %v2529_v0  ;;  %v1488_v14 = vadd.f32 %v2466_v44, %v2534_v25 }
  0xb0   :  { %v526_v41 = vmul.f32 0.014652015, %v494_v17  ;;  %v1678_v6 = vadd.f32 %v1646_v63, %v1390_v34  ;;  %v1359_v49 = vmul.f32 0.05860806, %v1327_v58  ;;  %v1264_v59 = vadd.f32 %v1200_v10, %v2602_v5  ;;  %v2674_v17 = vld [vmem:[#allocation2 + $0x15b] sm:$0xff] }
  0xb1   :  { %v366_v45 = vadd.f32 %v2593_v23, %v302_v54  ;;  %v751_v27 = vadd.f32 %v2661_v46, %v687_v60  ;;  %v1040_v48 = vadd.f32 %v2663_v4, %v976_v32  ;;  %v1552_v2 = vadd.f32 %v1488_v14, %v2542_v13 }
  0xb2   :  { %v814_v21 = vadd.f32 %v782_v16, %v526_v41  ;;  %v1774_v42 = vadd.f32 %v1742_v28, %v1678_v6  ;;  %v1743_v63 = vmul.f32 0.15018316, %v2499_v50  ;;  %v174_v57 = vadd.f32 %v1199_v12, %v2484_v7  ;;  %v2682_v12 = vld [vmem:[#allocation2 + $0x168] sm:$0xff] }
  0xb3   :  { %v431_v22 = vadd.f32 %v2666_v9, %v366_v45  ;;  %v1647_v33 = vmul.f32 0.0952381, %v1615_v61  ;;  %v783_v16 = vmul.f32 0.0036630037, %v751_v27  ;;  %v1328_v1 = vadd.f32 %v1264_v59, %v2609_v20 }
  0xb4   :  { %v1103_v58 = vadd.f32 %v1071_v39, %v814_v21  ;;  %1806 = vst [vmem:[#allocation5 + $0x98] sm:$0xff] %v1774_v42  ;;  %v1072_v34 = vmul.f32 0.025641026, %v1040_v48  ;;  %v238_v54 = vadd.f32 %v2492_v62, %v174_v57  ;;  %v624_v28 = vadd.f32 %v2428_v26, %v2418_v40 }
  0xb5   :  { %v495_v43 = vadd.f32 %v2674_v17, %v431_v22  ;;  %v1616_v60 = vadd.f32 %v1552_v2, %v2598_v31  ;;  %v913_v39 = vadd.f32 %v2434_v18, %v2550_v24  ;;  %v1201_v61 = vadd.f32 %v2509_v19, %v2502_v53  ;;  %v2698_v19 = vld [vmem:[#allocation2 + $0x16a] sm:$0xff] }
  0xb6   :  { %v1391_v41 = vadd.f32 %v1359_v49, %v1103_v58  ;;  %v303_v14 = vadd.f32 %v2616_v35, %v238_v54  ;;  %v688_v6 = vadd.f32 %v2682_v12, %v624_v28  ;;  %v1489_v45 = vadd.f32 %v2499_v50, %v2570_v3  ;;  %v2692_v49 = vld [vmem:[#allocation2 + $0x16c] sm:$0xff] }
  0xb7   :  { %v527_v32 = vmul.f32 0.014652015, %v495_v43  ;;  %v1360_v26 = vmul.f32 0.05860806, %v1328_v1  ;;  %v977_v59 = vadd.f32 %v913_v39, %v2560_v36  ;;  %v1265_v21 = vadd.f32 %v1201_v61, %v2634_v11  ;;  %v2702_v22 = vld [vmem:[#allocation2 + $0x169] sm:$0xff] }
  0xb8   :  { %v1679_v40 = vadd.f32 %v1647_v33, %v1391_v41  ;;  %v367_v27 = vadd.f32 %v2624_v38, %v303_v14  ;;  %v752_v53 = vadd.f32 %v2692_v49, %v688_v6  ;;  %v1553_v48 = vadd.f32 %v1489_v45, %v2576_v15  ;;  %v2708_v54 = vld [vmem:[#allocation2 + $0x16b] sm:$0xff] }
  0xb9   :  { %v815_v18 = vadd.f32 %v783_v16, %v527_v32  ;;  %v1744_v42 = vmul.f32 0.15018316, %v2531_v30  ;;  %v1041_v57 = vadd.f32 %v2698_v19, %v977_v59  ;;  %v175_v58 = vadd.f32 %v1200_v10, %v2520_v29 }
  0xba   :  { %v1775_v2 = vadd.f32 %v1743_v63, %v1679_v40  ;;  %v1648_v1 = vmul.f32 0.0952381, %v1616_v60  ;;  %v432_v16 = vadd.f32 %v2702_v22, %v367_v27  ;;  %v1329_v43 = vadd.f32 %v1265_v21, %v2641_v52  ;;  %v2715_v60 = vld [vmem:[#allocation2 + $0x170] sm:$0xff] }
  0xbb   :  { %v1104_v33 = vadd.f32 %v1072_v34, %v815_v18  ;;  %v784_v28 = vmul.f32 0.0036630037, %v752_v53  ;;  %v1617_v63 = vadd.f32 %v1553_v48, %v2631_v51  ;;  %v239_v41 = vadd.f32 %v2529_v0, %v175_v58  ;;  %v2725_v21 = vld [vmem:[#allocation2 + $0x174] sm:$0xff] }
  0xbc   :  { %1807 = vst [vmem:[#allocation5 + $0xa0] sm:$0xff] %v1775_v2  ;;  %v625_v39 = vadd.f32 %v2461_v37, %v2451_v55  ;;  %v496_v10 = vadd.f32 %v2708_v54, %v432_v16  ;;  %v1073_v34 = vmul.f32 0.025641026, %v1041_v57  ;;  %v914_v14 = vadd.f32 %v2466_v44, %v2583_v56  ;;  %v2730_v53 = vld [vmem:[#allocation2 + $0x172] sm:$0xff] }
  0xbd   :  { %v1392_v32 = vadd.f32 %v1360_v26, %v1104_v33  ;;  %v304_v6 = vadd.f32 %v2652_v47, %v239_v41  ;;  %v1202_v40 = vadd.f32 %v2542_v13, %v2534_v25  ;;  %v1490_v59 = vadd.f32 %v2531_v30, %v2602_v5  ;;  %v2734_v57 = vld [vmem:[#allocation2 + $0x171] sm:$0xff] }
  0xbe   :  { %v689_v45 = vadd.f32 %v2715_v60, %v625_v39  ;;  %v528_v37 = vmul.f32 0.014652015, %v496_v10  ;;  %v1361_v26 = vmul.f32 0.05860806, %v1329_v43  ;;  %v978_v18 = vadd.f32 %v914_v14, %v2593_v23 }
  0xbf   :  { %v1680_v55 = vadd.f32 %v1648_v1, %v1392_v32  ;;  %v368_v27 = vadd.f32 %v2661_v46, %v304_v6  ;;  %v1266_v48 = vadd.f32 %v1202_v40, %v2666_v9  ;;  %v1554_v25 = vadd.f32 %v1490_v59, %v2609_v20  ;;  %v2741_v32 = vld [vmem:[#allocation2 + $0x173] sm:$0xff]  ;;  %v2748_v6 = vld [vmem:[#allocation2 + $0x180] sm:$0xff] }
  0xc0   :  { %v753_v44 = vadd.f32 %v2725_v21, %v689_v45  ;;  %v816_v2 = vadd.f32 %v784_v28, %v528_v37  ;;  %v1042_v58 = vadd.f32 %v2730_v53, %v978_v18  ;;  %v176_v33 = vadd.f32 %v1201_v61, %v2550_v24  ;;  %v2754_v37 = vld [vmem:[#allocation2 + $0x182] sm:$0xff] }
  0xc1   :  { %v1776_v13 = vadd.f32 %v1744_v42, %v1680_v55  ;;  %v1649_v1 = vmul.f32 0.0952381, %v1617_v63  ;;  %v1745_v16 = vmul.f32 0.15018316, %v2566_v8  ;;  %v433_v43 = vadd.f32 %v2734_v57, %v368_v27  ;;  %v2758_v27 = vld [vmem:[#allocation2 + $0x181] sm:$0xff] }
  0xc2   :  { %v1330_v41 = vadd.f32 %v1266_v48, %v2674_v17  ;;  %v1105_v39 = vadd.f32 %v1073_v34, %v816_v2  ;;  %v785_v10 = vmul.f32 0.0036630037, %v753_v44  ;;  %v240_v42 = vadd.f32 %v2560_v36, %v176_v33  ;;  %v2760_v44 = vld [vmem:[#allocation2 + $0x184] sm:$0xff] }
  0xc3   :  { %1808 = vst [vmem:[#allocation5 + $0xa8] sm:$0xff] %v1776_v13  ;;  %v626_v28 = vadd.f32 %v2492_v62, %v2484_v7  ;;  %v497_v14 = vadd.f32 %v2741_v32, %v433_v43  ;;  %v1074_v61 = vmul.f32 0.025641026, %v1042_v58  ;;  %v1618_v63 = vadd.f32 %v1554_v25, %v2663_v4 }
  0xc4   :  { %v915_v45 = vadd.f32 %v2499_v50, %v2616_v35  ;;  %v1393_v59 = vadd.f32 %v1361_v26, %v1105_v39  ;;  %v305_v34 = vadd.f32 %v2682_v12, %v240_v42  ;;  %v1203_v7 = vadd.f32 %v2576_v15, %v2570_v3  ;;  %v2768_v3 = vld [vmem:[#allocation2 + $0x183] sm:$0xff] }
  0xc5   :  { %v690_v55 = vadd.f32 %v2748_v6, %v626_v28  ;;  %v529_v62 = vmul.f32 0.014652015, %v497_v14  ;;  %v1362_v18 = vmul.f32 0.05860806, %v1330_v41  ;;  %v1491_v50 = vadd.f32 %v2566_v8, %v2634_v11 }
  0xc6   :  { %v979_v48 = vadd.f32 %v915_v45, %v2624_v38  ;;  %v1681_v26 = vadd.f32 %v1649_v1, %v1393_v59  ;;  %v369_v25 = vadd.f32 %v2692_v49, %v305_v34  ;;  %v1267_v2 = vadd.f32 %v1203_v7, %v2702_v22 }
  0xc7   :  { %v754_v13 = vadd.f32 %v2760_v44, %v690_v55  ;;  %v817_v58 = vadd.f32 %v785_v10, %v529_v62  ;;  %v1555_v33 = vadd.f32 %v1491_v50, %v2641_v52  ;;  %v177_v43 = vadd.f32 %v1202_v40, %v2583_v56  ;;  %v2784_v62 = vld [vmem:[#allocation2 + $0x188] sm:$0xff] }
  0xc8   :  { %v1043_v15 = vadd.f32 %v2754_v37, %v979_v48  ;;  %v1777_v41 = vadd.f32 %v1745_v16, %v1681_v26  ;;  %v1650_v39 = vmul.f32 0.0952381, %v1618_v63  ;;  %v1746_v42 = vmul.f32 0.15018316, %v2598_v31  ;;  %v2786_v48 = vld [vmem:[#allocation2 + $0x18a] sm:$0xff] }
  0xc9   :  { %v434_v1 = vadd.f32 %v2758_v27, %v369_v25  ;;  %v1106_v28 = vadd.f32 %v1074_v61, %v817_v58  ;;  %v786_v14 = vmul.f32 0.0036630037, %v754_v13  ;;  %v1331_v45 = vadd.f32 %v1267_v2, %v2708_v54  ;;  %v2790_v25 = vld [vmem:[#allocation2 + $0x189] sm:$0xff] }
  0xca   :  { %v241_v10 = vadd.f32 %v2593_v23, %v177_v43  ;;  %1809 = vst [vmem:[#allocation5 + $0xb0] sm:$0xff] %v1777_v41  ;;  %v1075_v34 = vmul.f32 0.025641026, %v1043_v15  ;;  %v627_v55 = vadd.f32 %v2529_v0, %v2520_v29  ;;  %v916_v40 = vadd.f32 %v2531_v30, %v2652_v47  ;;  %v2797_v58 = vld [vmem:[#allocation2 + $0x18c] sm:$0xff] }
  0xcb   :  { %v498_v59 = vadd.f32 %v2768_v3, %v434_v1  ;;  %v1394_v16 = vadd.f32 %v1362_v18, %v1106_v28  ;;  %v1619_v63 = vadd.f32 %v1555_v33, %v2698_v19  ;;  %v1204_v50 = vadd.f32 %v2609_v20, %v2602_v5  ;;  %v2800_v5 = vld [vmem:[#allocation2 + $0x18b] sm:$0xff] }
  0xcc   :  { %v306_v61 = vadd.f32 %v2715_v60, %v241_v10  ;;  %v691_v29 = vadd.f32 %v2784_v62, %v627_v55  ;;  %v980_v0 = vadd.f32 %v916_v40, %v2661_v46  ;;  %v1492_v30 = vadd.f32 %v2598_v31, %v2666_v9 }
  0xcd   :  { %v530_v26 = vmul.f32 0.014652015, %v498_v59  ;;  %v1682_v18 = vadd.f32 %v1650_v39, %v1394_v16  ;;  %v1363_v13 = vmul.f32 0.05860806, %v1331_v45  ;;  %v1268_v15 = vadd.f32 %v1204_v50, %v2734_v57 }
  0xce   :  { %v370_v2 = vadd.f32 %v2725_v21, %v306_v61  ;;  %v755_v20 = vadd.f32 %v2797_v58, %v691_v29  ;;  %v1044_v43 = vadd.f32 %v2786_v48, %v980_v0  ;;  %v1556_v41 = vadd.f32 %v1492_v30, %v2674_v17  ;;  %v2814_v0 = vld [vmem:[#allocation2 + $0x198] sm:$0xff] }
  0xcf   :  { %v818_v33 = vadd.f32 %v786_v14, %v530_v26  ;;  %v1778_v1 = vadd.f32 %v1746_v42, %v1682_v18  ;;  %v1747_v28 = vmul.f32 0.15018316, %v2631_v51  ;;  %v178_v45 = vadd.f32 %v1203_v7, %v2616_v35 }
  0xd0   :  { %v435_v39 = vadd.f32 %v2790_v25, %v370_v2  ;;  %v1651_v59 = vmul.f32 0.0952381, %v1619_v63  ;;  %v787_v55 = vmul.f32 0.0036630037, %v755_v20  ;;  %v1332_v14 = vadd.f32 %v1268_v15, %v2741_v32  ;;  %v2822_v2 = vld [vmem:[#allocation2 + $0x19a] sm:$0xff] }
  0xd1   :  { %v1107_v10 = vadd.f32 %v1075_v34, %v818_v33  ;;  %1810 = vst [vmem:[#allocation5 + $0xb8] sm:$0xff] %v1778_v1  ;;  %v1076_v16 = vmul.f32 0.025641026, %v1044_v43  ;;  %v242_v61 = vadd.f32 %v2624_v38, %v178_v45  ;;  %v628_v42 = vadd.f32 %v2560_v36, %v2550_v24  ;;  %v2826_v15 = vld [vmem:[#allocation2 + $0x199] sm:$0xff] }
  0xd2   :  { %v499_v40 = vadd.f32 %v2800_v5, %v435_v39  ;;  %v1620_v29 = vadd.f32 %v1556_v41, %v2730_v53  ;;  %v917_v7 = vadd.f32 %v2566_v8, %v2682_v12  ;;  %v1205_v34 = vadd.f32 %v2641_v52, %v2634_v11  ;;  %v2828_v33 = vld [vmem:[#allocation2 + $0x19c] sm:$0xff] }
  0xd3   :  { %v1395_v26 = vadd.f32 %v1363_v13, %v1107_v10  ;;  %v307_v30 = vadd.f32 %v2748_v6, %v242_v61  ;;  %v692_v18 = vadd.f32 %v2814_v0, %v628_v42  ;;  %v1493_v24 = vadd.f32 %v2631_v51, %v2702_v22  ;;  %v2836_v45 = vld [vmem:[#allocation2 + $0x19b] sm:$0xff] }
  0xd4   :  { %v531_v63 = vmul.f32 0.014652015, %v499_v40  ;;  %v1364_v13 = vmul.f32 0.05860806, %v1332_v14  ;;  %v981_v8 = vadd.f32 %v917_v7, %v2692_v49  ;;  %v1269_v11 = vadd.f32 %v1205_v34, %v2758_v27 }
  0xd5   :  { %v1683_v36 = vadd.f32 %v1651_v59, %v1395_v26  ;;  %v371_v20 = vadd.f32 %v2760_v44, %v307_v30  ;;  %v756_v43 = vadd.f32 %v2828_v33, %v692_v18  ;;  %v1557_v41 = vadd.f32 %v1493_v24, %v2708_v54 }
  0xd6   :  { %v819_v52 = vadd.f32 %v787_v55, %v531_v63  ;;  %v1748_v39 = vmul.f32 0.15018316, %v2663_v4  ;;  %v1045_v10 = vadd.f32 %v2822_v2, %v981_v8  ;;  %v179_v59 = vadd.f32 %v1204_v50, %v2652_v47  ;;  %v2847_v50 = vld [vmem:[#allocation2 + $0x1a0] sm:$0xff] }
  0xd7   :  { %v1779_v1 = vadd.f32 %v1747_v28, %v1683_v36  ;;  %v1652_v40 = vmul.f32 0.0952381, %v1620_v29  ;;  %v436_v61 = vadd.f32 %v2826_v15, %v371_v20  ;;  %v1333_v55 = vadd.f32 %v1269_v11, %v2768_v3  ;;  %v2853_v36 = vld [vmem:[#allocation2 + $0x1a2] sm:$0xff] }
  0xd8   :  { %v1108_v14 = vadd.f32 %v1076_v16, %v819_v52  ;;  %v788_v42 = vmul.f32 0.0036630037, %v756_v43  ;;  %v1621_v26 = vadd.f32 %v1557_v41, %v2754_v37  ;;  %v243_v28 = vadd.f32 %v2661_v46, %v179_v59  ;;  %v2859_v52 = vld [vmem:[#allocation2 + $0x1a1] sm:$0xff] }
  0xd9   :  { %1811 = vst [vmem:[#allocation5 + $0xc0] sm:$0xff] %v1779_v1  ;;  %v629_v7 = vadd.f32 %v2593_v23, %v2583_v56  ;;  %v500_v30 = vadd.f32 %v2836_v45, %v436_v61  ;;  %v1077_v18 = vmul.f32 0.025641026, %v1045_v10  ;;  %v918_v16 = vadd.f32 %v2598_v31, %v2715_v60  ;;  %v2861_v20 = vld [vmem:[#allocation2 + $0x1a4] sm:$0xff] }
  0xda   :  { %v1396_v63 = vadd.f32 %v1364_v13, %v1108_v14  ;;  %v308_v29 = vadd.f32 %v2784_v62, %v243_v28  ;;  %v1206_v8 = vadd.f32 %v2674_v17, %v2666_v9  ;;  %v1494_v56 = vadd.f32 %v2663_v4, %v2734_v57  ;;  %v2868_v59 = vld [vmem:[#allocation2 + $0x1a3] sm:$0xff] }
  0xdb   :  { %v693_v24 = vadd.f32 %v2847_v50, %v629_v7  ;;  %v532_v13 = vmul.f32 0.014652015, %v500_v30  ;;  %v1365_v11 = vmul.f32 0.05860806, %v1333_v55  ;;  %v982_v31 = vadd.f32 %v918_v16, %v2725_v21 }
  0xdc   :  { %v1684_v23 = vadd.f32 %v1652_v40, %v1396_v63  ;;  %v372_v43 = vadd.f32 %v2797_v58, %v308_v29  ;;  %v1270_v1 = vadd.f32 %v1206_v8, %v2790_v25  ;;  %v1558_v9 = vadd.f32 %v1494_v56, %v2741_v32 }
  0xdd   :  { %v757_v41 = vadd.f32 %v2861_v20, %v693_v24  ;;  %v820_v10 = vadd.f32 %v788_v42, %v532_v13  ;;  %v1046_v14 = vadd.f32 %v2853_v36, %v982_v31  ;;  %v180_v40 = vadd.f32 %v1205_v34, %v2682_v12  ;;  %v2886_v13 = vld [vmem:[#allocation2 + $0x1b2] sm:$0xff] }
  0xde   :  { %v1780_v17 = vadd.f32 %v1748_v39, %v1684_v23  ;;  %v1653_v61 = vmul.f32 0.0952381, %v1621_v26  ;;  %v1749_v55 = vmul.f32 0.15018316, %v2698_v19  ;;  %v437_v28 = vadd.f32 %v2859_v52, %v372_v43  ;;  %v2880_v26 = vld [vmem:[#allocation2 + $0x1b0] sm:$0xff] }
  0xdf   :  { %v1334_v7 = vadd.f32 %v1270_v1, %v2800_v5  ;;  %v1109_v63 = vadd.f32 %v1077_v18, %v820_v10  ;;  %v789_v30 = vmul.f32 0.0036630037, %v757_v41  ;;  %v244_v16 = vadd.f32 %v2692_v49, %v180_v40  ;;  %v2890_v43 = vld [vmem:[#allocation2 + $0x1b1] sm:$0xff] }
  0xe0   :  { %1812 = vst [vmem:[#allocation5 + $0xc8] sm:$0xff] %v1780_v17  ;;  %v630_v39 = vadd.f32 %v2624_v38, %v2616_v35  ;;  %v501_v42 = vadd.f32 %v2868_v59, %v437_v28  ;;  %v1078_v29 = vmul.f32 0.025641026, %v1046_v14  ;;  %v1622_v34 = vadd.f32 %v1558_v9, %v2786_v48  ;;  %v2892_v41 = vld [vmem:[#allocation2 + $0x1b4] sm:$0xff] }
  0xe1   :  { %v919_v24 = vadd.f32 %v2631_v51, %v2748_v6  ;;  %v1397_v56 = vadd.f32 %v1365_v11, %v1109_v63  ;;  %v309_v23 = vadd.f32 %v2814_v0, %v244_v16  ;;  %v1207_v35 = vadd.f32 %v2708_v54, %v2702_v22  ;;  %v2900_v22 = vld [vmem:[#allocation2 + $0x1b3] sm:$0xff] }
  0xe2   :  { %v694_v18 = vadd.f32 %v2880_v26, %v630_v39  ;;  %v533_v38 = vmul.f32 0.014652015, %v501_v42  ;;  %v1366_v31 = vmul.f32 0.05860806, %v1334_v7  ;;  %v1495_v51 = vadd.f32 %v2698_v19, %v2758_v27 }
  0xe3   :  { %v983_v1 = vadd.f32 %v919_v24, %v2760_v44  ;;  %v1685_v11 = vadd.f32 %v1653_v61, %v1397_v56  ;;  %v373_v9 = vadd.f32 %v2828_v33, %v309_v23  ;;  %v1271_v10 = vadd.f32 %v1207_v35, %v2826_v15 }
  0xe4   :  { %v758_v17 = vadd.f32 %v2892_v41, %v694_v18  ;;  %v821_v14 = vadd.f32 %v789_v30, %v533_v38  ;;  %v1559_v40 = vadd.f32 %v1495_v51, %v2768_v3  ;;  %v181_v28 = vadd.f32 %v1206_v8, %v2715_v60  ;;  %v2916_v38 = vld [vmem:[#allocation2 + $0x1b8] sm:$0xff] }
  0xe5   :  { %v1047_v54 = vadd.f32 %v2886_v13, %v983_v1  ;;  %v1781_v7 = vadd.f32 %v1749_v55, %v1685_v11  ;;  %v1654_v63 = vmul.f32 0.0952381, %v1622_v34  ;;  %v1750_v16 = vmul.f32 0.15018316, %v2730_v53  ;;  %v2918_v1 = vld [vmem:[#allocation2 + $0x1ba] sm:$0xff] }
  0xe6   :  { %v438_v61 = vadd.f32 %v2890_v43, %v373_v9  ;;  %v1110_v39 = vadd.f32 %v1078_v29, %v821_v14  ;;  %v790_v42 = vmul.f32 0.0036630037, %v758_v17  ;;  %v1335_v24 = vadd.f32 %v1271_v10, %v2836_v45  ;;  %v2922_v9 = vld [vmem:[#allocation2 + $0x1b9] sm:$0xff] }
  0xe7   :  { %v245_v30 = vadd.f32 %v2725_v21, %v181_v28  ;;  %1813 = vst [vmem:[#allocation5 + $0xd0] sm:$0xff] %v1781_v7  ;;  %v1079_v23 = vmul.f32 0.025641026, %v1047_v54  ;;  %v631_v18 = vadd.f32 %v2661_v46, %v2652_v47  ;;  %v920_v8 = vadd.f32 %v2663_v4, %v2784_v62  ;;  %v2929_v14 = vld [vmem:[#allocation2 + $0x1bc] sm:$0xff] }
  0xe8   :  { %v502_v56 = vadd.f32 %v2900_v22, %v438_v61  ;;  %v1398_v55 = vadd.f32 %v1366_v31, %v1110_v39  ;;  %v1623_v34 = vadd.f32 %v1559_v40, %v2822_v2  ;;  %v1208_v51 = vadd.f32 %v2741_v32, %v2734_v57  ;;  %v2932_v57 = vld [vmem:[#allocation2 + $0x1bb] sm:$0xff] }
  0xe9   :  { %v310_v29 = vadd.f32 %v2847_v50, %v245_v30  ;;  %v695_v47 = vadd.f32 %v2916_v38, %v631_v18  ;;  %v984_v46 = vadd.f32 %v920_v8, %v2797_v58  ;;  %v1496_v4 = vadd.f32 %v2730_v53, %v2790_v25  ;;  %v664_v8 = vld [vmem:[#allocation2 + $0x1c8] sm:$0xff] }
  0xea   :  { %v534_v11 = vmul.f32 0.014652015, %v502_v56  ;;  %v1686_v31 = vadd.f32 %v1654_v63, %v1398_v55  ;;  %v1367_v17 = vmul.f32 0.05860806, %v1335_v24  ;;  %v1272_v54 = vadd.f32 %v1208_v51, %v2859_v52 }
  0xeb   :  { %v374_v10 = vadd.f32 %v2861_v20, %v310_v29  ;;  %v759_v32 = vadd.f32 %v2929_v14, %v695_v47  ;;  %v1048_v28 = vadd.f32 %v2918_v1, %v984_v46  ;;  %v1560_v7 = vadd.f32 %v1496_v4, %v2800_v5  ;;  %v728_v4 = vld [vmem:[#allocation2 + $0x1cc] sm:$0xff] }
  0xec   :  { %v822_v40 = vadd.f32 %v790_v42, %v534_v11  ;;  %v1782_v61 = vadd.f32 %v1750_v16, %v1686_v31  ;;  %v1751_v39 = vmul.f32 0.15018316, %v2754_v37  ;;  %v182_v24 = vadd.f32 %v1207_v35, %v2748_v6 }
  0xed   :  { %v439_v63 = vadd.f32 %v2922_v9, %v374_v10  ;;  %v1655_v56 = vmul.f32 0.0952381, %v1623_v34  ;;  %v791_v18 = vmul.f32 0.0036630037, %v759_v32  ;;  %v1336_v42 = vadd.f32 %v1272_v54, %v2868_v59 }
  0xee   :  { %v1111_v30 = vadd.f32 %v1079_v23, %v822_v40  ;;  %1814 = vst [vmem:[#allocation5 + $0xd8] sm:$0xff] %v1782_v61  ;;  %v1080_v29 = vmul.f32 0.025641026, %v1048_v28  ;;  %v246_v11 = vadd.f32 %v2760_v44, %v182_v24  ;;  %v632_v16 = vadd.f32 %v2692_v49, %v2682_v12  ;;  %v408_v12 = vld [vmem:[#allocation2 + $0x1c9] sm:$0xff] }
  0xef   :  { %v503_v55 = vadd.f32 %v2932_v57, %v439_v63  ;;  %v1624_v46 = vadd.f32 %v1560_v7, %v2853_v36  ;;  %v921_v6 = vadd.f32 %v2698_v19, %v2814_v0  ;;  %v1209_v35 = vadd.f32 %v2768_v3, %v2758_v27  ;;  %v472_v28 = vld [vmem:[#allocation2 + $0x1cb] sm:$0xff] }
  0xf0   :  { %v1399_v47 = vadd.f32 %v1367_v17, %v1111_v30  ;;  %v311_v34 = vadd.f32 %v2880_v26, %v246_v11  ;;  %v696_v31 = vadd.f32 %v664_v8, %v632_v16  ;;  %v1497_v44 = vadd.f32 %v2754_v37, %v2826_v15  ;;  %v1017_v17 = vld [vmem:[#allocation2 + $0x1ca] sm:$0xff] }
  0xf1   :  { %v535_v23 = vmul.f32 0.014652015, %v503_v55  ;;  %v1368_v54 = vmul.f32 0.05860806, %v1336_v42  ;;  %v985_v49 = vadd.f32 %v921_v6, %v2828_v33  ;;  %v1273_v40 = vadd.f32 %v1209_v35, %v2890_v43  ;;  %v665_v33 = vld [vmem:[#allocation2 + $0x1d0] sm:$0xff] }
  0xf2   :  { %v1687_v10 = vadd.f32 %v1655_v56, %v1399_v47  ;;  %v375_v19 = vadd.f32 %v2892_v41, %v311_v34  ;;  %v760_v0 = vadd.f32 %v728_v4, %v696_v31  ;;  %v1561_v27 = vadd.f32 %v1497_v44, %v2836_v45 }
  0xf3   :  { %v823_v32 = vadd.f32 %v791_v18, %v535_v23  ;;  %v1752_v26 = vmul.f32 0.15018316, %v2786_v48  ;;  %v183_v37 = vadd.f32 %v1208_v51, %v2784_v62  ;;  %v1656_v7 = vmul.f32 0.0952381, %v1624_v46  ;;  %v729_v18 = vld [vmem:[#allocation2 + $0x1d4] sm:$0xff] }
  0xf4   :  { %v1783_v3 = vadd.f32 %v1751_v39, %v1687_v10  ;;  %v440_v61 = vadd.f32 %v408_v12, %v375_v19  ;;  %v1049_v63 = vadd.f32 %v1017_v17, %v985_v49  ;;  %v792_v24 = vmul.f32 0.0036630037, %v760_v0  ;;  %v473_v46 = vld [vmem:[#allocation2 + $0x1d3] sm:$0xff] }
  0xf5   :  { %v1112_v15 = vadd.f32 %v1080_v29, %v823_v32  ;;  %v1337_v43 = vadd.f32 %v1273_v40, %v2900_v22  ;;  %v247_v41 = vadd.f32 %v2797_v58, %v183_v37  ;;  %v633_v45 = vadd.f32 %v2725_v21, %v2715_v60  ;;  %v409_v21 = vld [vmem:[#allocation2 + $0x1d1] sm:$0xff] }
  0xf6   :  { %1815 = vst [vmem:[#allocation5 + $0xe0] sm:$0xff] %v1783_v3  ;;  %v504_v30 = vadd.f32 %v472_v28, %v440_v61  ;;  %v1625_v56 = vadd.f32 %v1561_v27, %v2886_v13  ;;  %v922_v62 = vadd.f32 %v2730_v53, %v2847_v50  ;;  %v1210_v8 = vadd.f32 %v2800_v5, %v2790_v25  ;;  %v1018_v13 = vld [vmem:[#allocation2 + $0x1d2] sm:$0xff] }
  0xf7   :  { %v1400_v39 = vadd.f32 %v1368_v54, %v1112_v15  ;;  %v312_v51 = vadd.f32 %v2916_v38, %v247_v41  ;;  %v697_v42 = vadd.f32 %v665_v33, %v633_v45  ;;  %v1498_v58 = vadd.f32 %v2786_v48, %v2859_v52 }
  0xf8   :  { %v536_v55 = vmul.f32 0.014652015, %v504_v30  ;;  %v1081_v60 = vmul.f32 0.025641026, %v1049_v63  ;;  %v986_v29 = vadd.f32 %v922_v62, %v2861_v20  ;;  %v1274_v53 = vadd.f32 %v1210_v8, %v2922_v9 }
  0xf9   :  { %v1688_v22 = vadd.f32 %v1656_v7, %v1400_v39  ;;  %v376_v11 = vadd.f32 %v2929_v14, %v312_v51  ;;  %v761_v16 = vadd.f32 %v729_v18, %v697_v42  ;;  %v1369_v47 = vmul.f32 0.05860806, %v1337_v43 }
  0xfa   :  { %v824_v38 = vadd.f32 %v792_v24, %v536_v55  ;;  %v1050_v5 = vadd.f32 %v1018_v13, %v986_v29  ;;  %v1562_v48 = vadd.f32 %v1498_v58, %v2868_v59  ;;  %v1657_v4 = vmul.f32 0.0952381, %v1625_v56 }
  0xfb   :  { %v1784_v50 = vadd.f32 %v1752_v26, %v1688_v22  ;;  %v441_v25 = vadd.f32 %v409_v21, %v376_v11  ;;  %v793_v35 = vmul.f32 0.0036630037, %v761_v16  ;;  %v1338_v20 = vadd.f32 %v1274_v53, %v2932_v57 }
  0xfc   :  { %v1113_v52 = vadd.f32 %v1081_v60, %v824_v38  ;;  %v1753_v14 = vmul.f32 0.15018316, %v2822_v2  ;;  %v1082_v9 = vmul.f32 0.025641026, %v1050_v5  ;;  %v1626_v31 = vadd.f32 %v1562_v48, %v2918_v1 }
  0xfd   :  { %1816 = vst [vmem:[#allocation5 + $0xe8] sm:$0xff] %v1784_v50  ;;  %v505_v6 = vadd.f32 %v473_v46, %v441_v25  ;;  %v1370_v54 = vmul.f32 0.05860806, %v1338_v20  ;;  %v1754_v40 = vmul.f32 0.15018316, %v2853_v36 }
  0xfe   :  { %v1401_v23 = vadd.f32 %v1369_v47, %v1113_v52  ;;  %v1658_v59 = vmul.f32 0.0952381, %v1626_v31 }
  0xff   :  { %v537_v34 = vmul.f32 0.014652015, %v505_v6 }
 0x100   :  { %v1689_v44 = vadd.f32 %v1657_v4, %v1401_v23 }
 0x101   :  { %v825_v10 = vadd.f32 %v793_v35, %v537_v34 }
 0x102   :  { %v1785_v12 = vadd.f32 %v1753_v14, %v1689_v44 }
 0x103   :  { %v1114_v49 = vadd.f32 %v1082_v9, %v825_v10 }
 0x104   :  { %1817 = vst [vmem:[#allocation5 + $0xf0] sm:$0xff] %v1785_v12 }
 0x105   :  { %v1402_v17 = vadd.f32 %v1370_v54, %v1114_v49 }
 0x107   :  { %v1690_v57 = vadd.f32 %v1658_v59, %v1402_v17 }
 0x109   :  { %v1786_v32 = vadd.f32 %v1754_v40, %v1690_v57 }
 0x10b   :  { %1818 = vst [vmem:[#allocation5 + $0xf8] sm:$0xff] %v1786_v32 }
 0x10c   :  { %1873 = shalt.err (!%p1870_p12)
}
 0x10d   :  { %s1874_s24 = scalar_lea.hbm %s2995_s1, 4096 }
 0x10e   :  { %p1875_p13 = scmp.ne.s32.totalorder %s2995_s1, %s1874_s24  ;;  %p1878_p0 = scmp.lt.u32.totalorder %s1874_s24, %s2995_s1 }
 0x110   :  { %p1880_p1 = pnand %p1878_p0, %p1875_p13 }
 0x112   :  { %1883 = shalt.err (!%p1880_p1)
}
 0x113   :  { %1830 = dma.vmem_to_hbm [thread:$0]  %s1825_s20, 4096, %s2995_s1, [#allocation4], %s1889_s16, %s1889_s16, %s1890_s17  }
 0x114   :  { %1886 = dma.done.wait [#allocation4], 4096  }
 0x115   :  { %1887 = vsyncadd [#allocation4], 4294963200 }
 0x116   :  { %1834 = vsyncpa [#allocation3], 1 }
 0x117   :  { %1835 = vsyncpa [#allocation4], 1 }

</bundles_post_ra>
